<compile_context>
chip_gen: v7x
topology: tpu7x:2x2x1
jax: 0.10.0
libtpu: 0.0.40
codegen_flags: <defaults>
</compile_context>

<pallas_src>
import functools

import jax
import jax.numpy as jnp
from jax import lax
from jax.experimental import pallas as pl
from jax.experimental.pallas import tpu as pltpu


# -----------------------------------------------------------------------------
# Wrapper-side weight preparation (done ONCE in DecoderBlock.__init__)
# -----------------------------------------------------------------------------
def _fold_upsample_into_taps(w_hwio):
    """(3,3,Cin,Cout) HWIO conv weights -> (9*Cin, 4*Cout) effective weights of
    the operator `3x3 conv(2x nearest upsample(x))`, evaluated as a 3x3 conv
    over the LOW-RES input.  Column blocks are ordered (py, px) = 00,01,10,11.

    Per-dimension fold matrix F_p[r, k] = 1 iff floor((p + (k-1)) / 2) == r-1,
    i.e. full-res tap k (offset k-1) of output parity p reads low-res offset r-1.
    """
    _, _, cin, cout = w_hwio.shape
    f0 = jnp.array([[1., 0., 0.], [0., 1., 1.], [0., 0., 0.]], jnp.float32)
    f1 = jnp.array([[0., 0., 0.], [1., 1., 0.], [0., 0., 1.]], jnp.float32)
    folds = (f0, f1)
    parts = []
    for py in (0, 1):
        for px in (0, 1):
            weff = jnp.einsum('ak,bl,klio->abio', folds[py], folds[px], w_hwio)
            parts.append(weff.reshape(9 * cin, cout))
    return jnp.concatenate(parts, axis=-1)


# -----------------------------------------------------------------------------
# In-kernel helpers (operate on values already resident in VMEM/vregs)
# -----------------------------------------------------------------------------
def _im2col_3x3(x):
    """(H, W, C) -> (H*W, 9*C) bf16 im2col patches of a zero-padded (pad=1)
    3x3 window.  No padded copy of the image is materialized: each tap view is
    built directly with zero boundary fill, in bf16, so on-chip copy/relayout
    traffic is half of an f32 build."""
    x = x.astype(jnp.bfloat16)
    H, W, C = x.shape
    zrow = jnp.zeros((1, W, C), jnp.bfloat16)
    zcol = jnp.zeros((H, 1, C), jnp.bfloat16)
    # Column (sublane) shifts are done once per dx and reused by the three row
    # taps; row shifts are outer-dim slab slices (cheap).
    x_m1 = jnp.concatenate([zcol, x[:, :W - 1, :]], axis=1)   # V[:,j] = X[:,j-1]
    x_p1 = jnp.concatenate([x[:, 1:, :], zcol], axis=1)       # V[:,j] = X[:,j+1]
    shifted = (x_m1, x, x_p1)                                 # dx = -1, 0, +1
    cols = []
    for dy in (-1, 0, 1):
        for v in shifted:
            if dy == -1:
                v = jnp.concatenate([zrow, v[:H - 1]], axis=0)   # V[y] = .[y-1]
            elif dy == 1:
                v = jnp.concatenate([v[1:], zrow], axis=0)       # V[y] = .[y+1]
            cols.append(v.reshape(H * W, C))
    return jnp.concatenate(cols, axis=-1)                        # (H*W, 9*C)


def _parity_interleave(xpar, h, w, c):
    """(h*w, 4*c) per-parity conv1 result -> (2h, 2w, c) full-resolution map."""
    def par(k):
        return xpar[:, k * c:(k + 1) * c].reshape(h, w, c)
    p00, p01, p10, p11 = par(0), par(1), par(2), par(3)
    # interleave even/odd output columns (sublane interleave)
    row_e = jnp.concatenate([p00[:, :, None, :], p01[:, :, None, :]],
                            axis=2).reshape(h * 2 * w, c).reshape(h, 2 * w, c)
    row_o = jnp.concatenate([p10[:, :, None, :], p11[:, :, None, :]],
                            axis=2).reshape(h * 2 * w, c).reshape(h, 2 * w, c)
    # interleave even/odd output rows (outer-dim merge: slab copies only)
    return jnp.concatenate([row_e[:, None], row_o[:, None]],
                           axis=1).reshape(2 * h, 2 * w, c)


# -----------------------------------------------------------------------------
# Fused decoder-block kernel (one batch element per grid step)
# -----------------------------------------------------------------------------
def _decoder_block_kernel(*refs, has_skip):
    """[2x nearest upsample -> concat skip -> conv3x3+ReLU -> conv3x3+ReLU]
    fully fused.  The upsample is folded into conv1's taps (matmul over LOW-RES
    patches with per-parity effective weights), the channel concat is a split-K
    sum, and every intermediate stays in VMEM (bf16 data, f32 accumulate)."""
    if has_skip:
        x_ref, s_ref, w1x_ref, w1s_ref, b1_ref, w2_ref, b2_ref, o_ref = refs
    else:
        x_ref, w1x_ref, b1_ref, w2_ref, b2_ref, o_ref = refs

    _, h, w, _ = x_ref.shape
    H, W = 2 * h, 2 * w
    c1 = b1_ref.shape[1]
    c2 = b2_ref.shape[1]

    # conv1, x branch: ONE matmul (h*w, 9*Cx) @ (9*Cx, 4*c1); N = 4*c1 lanes.
    patches_lo = _im2col_3x3(x_ref[0])
    xpar = jnp.dot(patches_lo, w1x_ref[...], preferred_element_type=jnp.float32)
    acc = _parity_interleave(xpar, h, w, c1).reshape(H * W, c1)

    # conv1, skip branch (split-K: the channel concat is never materialized).
    if has_skip:
        sp = _im2col_3x3(s_ref[0])
        acc = acc + jnp.dot(sp, w1s_ref[...], preferred_element_type=jnp.float32)

    y = jnp.maximum(acc + b1_ref[0, :], 0.0)                 # f32 epilogue (VPU)

    # conv2 + bias + ReLU; the intermediate never leaves VMEM.
    y3 = y.reshape(H, W, c1)
    out = jnp.maximum(
        jnp.dot(_im2col_3x3(y3), w2_ref[...], preferred_element_type=jnp.float32)
        + b2_ref[0, :], 0.0)

    # Natural NHWC store via a trivial split-reshape (no W-way lane pack).  At
    # c2 = 8/16 the masked vst is cheaper than the XLU lane-pack it replaces;
    # for c2 >= 64 this store is effectively lane-dense anyway.
    o_ref[...] = out.reshape(1, H, W, c2).astype(o_ref.dtype)


def decoder_block_forward(x_nhwc, skip_nhwc, w1x_par, w1s, b1r, w2r, b2r,
                          *, out_dtype=jnp.float32):
    """Fused UNet decoder block.

    x_nhwc   : (N, h, w, Cx)  f32 or bf16 (pre-upsample)
    skip_nhwc: (N, 2h, 2w, Cs) or None
    w1x_par  : (9*Cx, 4*C1) bf16  parity-folded conv1 x-branch weights
    w1s      : (9*Cs, C1)  bf16   conv1 skip-branch weights (or None)
    b1r, b2r : (1, C1)/(1, C2) f32;  w2r: (9*C1, C2) bf16
    returns  : (N, 2h, 2w, C2) out_dtype
    """
    N, h, w, cx = x_nhwc.shape
    H, W = 2 * h, 2 * w
    c1 = b1r.shape[-1]
    c2 = b2r.shape[-1]
    has_skip = skip_nhwc is not None
    assert w1x_par.shape == (9 * cx, 4 * c1), (w1x_par.shape, cx, c1)
    assert w2r.shape == (9 * c1, c2), (w2r.shape, c1, c2)

    in_specs = [pl.BlockSpec((1, h, w, cx), lambda n: (n, 0, 0, 0))]
    args = [x_nhwc]
    if has_skip:
        cs = skip_nhwc.shape[-1]
        assert skip_nhwc.shape == (N, H, W, cs), skip_nhwc.shape
        assert w1s is not None and w1s.shape == (9 * cs, c1), (w1s, cs, c1)
        in_specs.append(pl.BlockSpec((1, H, W, cs), lambda n: (n, 0, 0, 0)))
        args.append(skip_nhwc)
    in_specs.append(pl.BlockSpec(w1x_par.shape, lambda n: (0, 0)))
    args.append(w1x_par)
    if has_skip:
        in_specs.append(pl.BlockSpec(w1s.shape, lambda n: (0, 0)))
        args.append(w1s)
    in_specs += [pl.BlockSpec((1, c1), lambda n: (0, 0)),
                 pl.BlockSpec(w2r.shape, lambda n: (0, 0)),
                 pl.BlockSpec((1, c2), lambda n: (0, 0))]
    args += [b1r, w2r, b2r]

    # grid=(N,) "parallel": on v7x both TensorCores get one batch element each;
    # on single-TC v5e/v6e this is a short serial loop (~0.35 us/step).
    # TODO(synk): fold batch into the matmul M dim for single-TC chips at larger
    #             N, and add +1-halo row tiling (manual DMA / pl.Element) before
    #             real image sizes so per-stage VMEM stays inside v7x's 64 MiB.
    out = pl.pallas_call(
        functools.partial(_decoder_block_kernel, has_skip=has_skip),
        out_shape=jax.ShapeDtypeStruct((N, H, W, c2), out_dtype),
        grid=(N,),
        in_specs=in_specs,
        out_specs=pl.BlockSpec((1, H, W, c2), lambda n: (n, 0, 0, 0)),
        compiler_params=pltpu.CompilerParams(
            dimension_semantics=("parallel",)),
    )(*args)
    return out


# -----------------------------------------------------------------------------
# Pure-JAX reference (for numerical validation of the fused kernel)
# -----------------------------------------------------------------------------
def _conv3x3_relu_ref(x, w, b):
    y = lax.conv_general_dilated(
        x, w, window_strides=(1, 1), padding=((1, 1), (1, 1)),
        dimension_numbers=("NHWC", "HWIO", "NHWC"))
    return jnp.maximum(y + b, 0.0)


# -----------------------------------------------------------------------------
# Module glue (plain JAX/Python): mirrors the PyTorch UnetDecoder structure
# -----------------------------------------------------------------------------
class CenterBlockBase:
    # TODO(synk): identity center block (the reference leaves CenterBlockBase undefined).
    def __init__(self, channels):
        self.out_channels = channels

    def __call__(self, x):
        return x


class DecoderBlock:
    """2x nearest upsample -> concat skip -> conv3x3+ReLU -> conv3x3+ReLU,
    executed as ONE fused Pallas kernel per batch element."""

    def __init__(self, in_ch, skip_ch, out_ch, stage, key):
        k1, k2 = jax.random.split(key)
        c1_in = in_ch + skip_ch
        self.in_ch, self.skip_ch, self.out_ch = in_ch, skip_ch, out_ch
        self.w1 = (jax.random.normal(k1, (3, 3, c1_in, out_ch), jnp.float32)
                   / jnp.sqrt(9.0 * c1_in))
        self.b1 = jnp.zeros((out_ch,), jnp.float32)
        self.w2 = (jax.random.normal(k2, (3, 3, out_ch, out_ch), jnp.float32)
                   / jnp.sqrt(9.0 * out_ch))
        self.b2 = jnp.zeros((out_ch,), jnp.float32)

        # Prepared kernel-side weights, hoisted out of the per-call path:
        #  * conv1 x-part folded with the 2x nearest upsample into per-parity
        #    effective taps (ONE (9*in_ch, 4*out_ch) matrix),
        #  * conv1 skip-part and conv2 as plain tap-major im2col matrices,
        #  * everything the MXU touches pre-cast to bf16.
        self.w1x_par = _fold_upsample_into_taps(
            self.w1[:, :, :in_ch, :]).astype(jnp.bfloat16)
        self.w1s = (self.w1[:, :, in_ch:, :]
                    .reshape(9 * skip_ch, out_ch).astype(jnp.bfloat16)
                    if skip_ch > 0 else None)
        self.w2r = self.w2.reshape(9 * out_ch, out_ch).astype(jnp.bfloat16)
        self.b1r = self.b1.reshape(1, out_ch).astype(jnp.float32)
        self.b2r = self.b2.reshape(1, out_ch).astype(jnp.float32)

    def __call__(self, x, skip, out_dtype=jnp.float32):
        w1s = self.w1s if skip is not None else None
        return decoder_block_forward(x, skip, self.w1x_par, w1s, self.b1r,
                                     self.w2r, self.b2r, out_dtype=out_dtype)

    def reference(self, x, skip):
        x = jnp.repeat(jnp.repeat(x, 2, axis=1), 2, axis=2)
        if skip is not None:
            x = jnp.concatenate([x, skip], axis=-1)
        x = _conv3x3_relu_ref(x, self.w1, self.b1)
        x = _conv3x3_relu_ref(x, self.w2, self.b2)
        return x


class UnetDecoder:
    def __init__(self, in_channels, out_channels, block, center=None,
                 keep_all=False, *, key=None):
        center_channel = in_channels[0]
        if center is None:
            self.center = CenterBlockBase(center_channel)
        elif callable(center):
            self.center = center(center_channel)
        else:
            raise TypeError('Center module should be a callable object')
        skip_channels = list(in_channels[1:])
        in_channels = [self.center.out_channels] + list(out_channels[:-1])
        if not callable(block):
            raise TypeError('Block module should be a callable object')
        self.blocks = []
        keys = jax.random.split(key, len(out_channels))
        for stage, (i, s, o) in enumerate(zip(in_channels, skip_channels,
                                              out_channels)):
            self.blocks.append(block(i, s, o, stage, keys[stage]))
        self.keep_all = keep_all
        self.in_channels = in_channels
        self.out_channels = [self.center.out_channels] + list(out_channels)

    def __call__(self, *features):
        return self._forward(features, use_ref=False)

    def reference(self, *features):
        return self._forward(features, use_ref=True)

    def _forward(self, features, use_ref):
        # features are NHWC here
        features = features[1:]
        features = features[::-1]
        center = features[0]
        skips = features[1:]
        n_blocks = len(self.blocks)

        def run(i, blk, x, s):
            if use_ref:
                return blk.reference(x, s)
            # bf16 hand-off between fused stages halves inter-stage HBM traffic;
            # user-visible outputs (last stage / keep_all) stay float32.
            last = i == n_blocks - 1
            dt = jnp.float32 if (last or self.keep_all) else jnp.bfloat16
            return blk(x, s, out_dtype=dt)

        if self.keep_all:
            out = [self.center(center)]
            for i, decoder in enumerate(self.blocks):
                skip = skips[i] if i < len(skips) else None
                out.append(run(i, decoder, out[-1], skip))
        else:
            out = self.center(center)
            for i, decoder in enumerate(self.blocks):
                skip = skips[i] if i < len(skips) else None
                out = run(i, decoder, out, skip)
        return out


def nchw_to_nhwc(x):
    return jnp.transpose(x, (0, 2, 3, 1))


def nhwc_to_nchw(x):
    return jnp.transpose(x, (0, 3, 1, 2))


if __name__ == "__main__":
    key = jax.random.PRNGKey(0)
    k0, k1, k2, k3, kparams = jax.random.split(key, 5)

    # Encoder-style feature pyramid (NCHW, PyTorch convention):
    #   f0 is dropped by forward(); f3 (deepest) is the center input.
    f0 = jax.random.normal(k0, (2, 3, 32, 32), jnp.float32)
    f1 = jax.random.normal(k1, (2, 8, 16, 16), jnp.float32)
    f2 = jax.random.normal(k2, (2, 16, 8, 8), jnp.float32)
    f3 = jax.random.normal(k3, (2, 32, 4, 4), jnp.float32)

    # in_channels = [center_ch, skip_ch_stage0, skip_ch_stage1]
    decoder = UnetDecoder(in_channels=[32, 16, 8],
                          out_channels=[16, 8],
                          block=DecoderBlock,
                          center=None,
                          keep_all=False,
                          key=kparams)

    feats_nhwc = [nchw_to_nhwc(f) for f in (f0, f1, f2, f3)]
    out_nhwc = decoder(*feats_nhwc)
    out_nchw = nhwc_to_nchw(out_nhwc)
    jax.block_until_ready(out_nchw)

    assert out_nchw.shape == (2, 8, 16, 16), out_nchw.shape
    assert out_nchw.dtype == jnp.float32
    assert bool(jnp.all(out_nchw >= 0.0))  # final ReLU

    # Pure-JAX f32 reference; bf16 MXU inputs / bf16 inter-stage hand-off with
    # f32 accumulation => loose tolerance.
    ref_nhwc = decoder.reference(*feats_nhwc)
    err = float(jnp.max(jnp.abs(out_nhwc - ref_nhwc)))
    scale = float(jnp.max(jnp.abs(ref_nhwc))) + 1e-6
    assert err <= 6e-2 * scale + 1e-2, (err, scale)

    print("KERNEL_OK")
</pallas_src>

<mosaic_0001>
module attributes {stable_mosaic.version = 11 : i64} {
  func.func @_decoder_block_kernel(%arg0: i32, %arg1: memref<1x4x4x32xf32, #tpu.memory_space<vmem>>, %arg2: memref<1x8x8x16xf32, #tpu.memory_space<vmem>>, %arg3: memref<288x64xbf16, #tpu.memory_space<vmem>>, %arg4: memref<144x16xbf16, #tpu.memory_space<vmem>>, %arg5: memref<1x16xf32, #tpu.memory_space<vmem>>, %arg6: memref<144x16xbf16, #tpu.memory_space<vmem>>, %arg7: memref<1x16xf32, #tpu.memory_space<vmem>>, %arg8: memref<1x8x8x16xbf16, #tpu.memory_space<vmem>>) attributes {dimension_semantics = [#tpu.dimension_semantics<parallel>], iteration_bounds = array<i64: 2>, scalar_prefetch = 0 : i64, scratch_operands = 0 : i64, tpu.core_type = #tpu.core_type<tc>, window_params = [{transform_indices = @transform_0, window_bounds = array<i64: 1, 4, 4, 32>}, {transform_indices = @transform_1, window_bounds = array<i64: 1, 8, 8, 16>}, {pipeline_mode = #tpu.pipeline_mode<synchronous>, transform_indices = @transform_2, window_bounds = array<i64: 288, 64>}, {pipeline_mode = #tpu.pipeline_mode<synchronous>, transform_indices = @transform_3, window_bounds = array<i64: 144, 16>}, {pipeline_mode = #tpu.pipeline_mode<synchronous>, transform_indices = @transform_4, window_bounds = array<i64: 1, 16>}, {pipeline_mode = #tpu.pipeline_mode<synchronous>, transform_indices = @transform_5, window_bounds = array<i64: 144, 16>}, {pipeline_mode = #tpu.pipeline_mode<synchronous>, transform_indices = @transform_6, window_bounds = array<i64: 1, 16>}, {transform_indices = @transform_7, window_bounds = array<i64: 1, 8, 8, 16>}]} {
    %c0 = arith.constant 0 : index
    %c0_0 = arith.constant 0 : index
    %c0_1 = arith.constant 0 : index
    %c0_2 = arith.constant 0 : index
    %0 = vector.load %arg1[%c0, %c0_0, %c0_1, %c0_2] : memref<1x4x4x32xf32, #tpu.memory_space<vmem>>, vector<1x4x4x32xf32>
    %1 = vector.shape_cast %0 : vector<1x4x4x32xf32> to vector<4x4x32xf32>
    %2 = arith.truncf %1 : vector<4x4x32xf32> to vector<4x4x32xbf16>
    %cst = arith.constant 0.000000e+00 : bf16
    %3 = vector.broadcast %cst : bf16 to vector<1x4x32xbf16>
    %cst_3 = arith.constant 0.000000e+00 : bf16
    %4 = vector.broadcast %cst_3 : bf16 to vector<4x1x32xbf16>
    %5 = vector.extract_strided_slice %2 {offsets = [0, 0, 0], sizes = [4, 3, 32], strides = [1, 1, 1]} : vector<4x4x32xbf16> to vector<4x3x32xbf16>
    %6 = tpu.concatenate %4, %5 in 1 : vector<4x1x32xbf16>, vector<4x3x32xbf16> -> vector<4x4x32xbf16>
    %7 = vector.extract_strided_slice %2 {offsets = [0, 1, 0], sizes = [4, 3, 32], strides = [1, 1, 1]} : vector<4x4x32xbf16> to vector<4x3x32xbf16>
    %8 = tpu.concatenate %7, %4 in 1 : vector<4x3x32xbf16>, vector<4x1x32xbf16> -> vector<4x4x32xbf16>
    %9 = vector.extract_strided_slice %6 {offsets = [0, 0, 0], sizes = [3, 4, 32], strides = [1, 1, 1]} : vector<4x4x32xbf16> to vector<3x4x32xbf16>
    %10 = tpu.concatenate %3, %9 in 0 : vector<1x4x32xbf16>, vector<3x4x32xbf16> -> vector<4x4x32xbf16>
    %11 = vector.shape_cast %10 : vector<4x4x32xbf16> to vector<16x32xbf16>
    %12 = vector.extract_strided_slice %2 {offsets = [0, 0, 0], sizes = [3, 4, 32], strides = [1, 1, 1]} : vector<4x4x32xbf16> to vector<3x4x32xbf16>
    %13 = tpu.concatenate %3, %12 in 0 : vector<1x4x32xbf16>, vector<3x4x32xbf16> -> vector<4x4x32xbf16>
    %14 = vector.shape_cast %13 : vector<4x4x32xbf16> to vector<16x32xbf16>
    %15 = vector.extract_strided_slice %8 {offsets = [0, 0, 0], sizes = [3, 4, 32], strides = [1, 1, 1]} : vector<4x4x32xbf16> to vector<3x4x32xbf16>
    %16 = tpu.concatenate %3, %15 in 0 : vector<1x4x32xbf16>, vector<3x4x32xbf16> -> vector<4x4x32xbf16>
    %17 = vector.shape_cast %16 : vector<4x4x32xbf16> to vector<16x32xbf16>
    %18 = vector.shape_cast %6 : vector<4x4x32xbf16> to vector<16x32xbf16>
    %19 = vector.shape_cast %2 : vector<4x4x32xbf16> to vector<16x32xbf16>
    %20 = vector.shape_cast %8 : vector<4x4x32xbf16> to vector<16x32xbf16>
    %21 = vector.extract_strided_slice %6 {offsets = [1, 0, 0], sizes = [3, 4, 32], strides = [1, 1, 1]} : vector<4x4x32xbf16> to vector<3x4x32xbf16>
    %22 = tpu.concatenate %21, %3 in 0 : vector<3x4x32xbf16>, vector<1x4x32xbf16> -> vector<4x4x32xbf16>
    %23 = vector.shape_cast %22 : vector<4x4x32xbf16> to vector<16x32xbf16>
    %24 = vector.extract_strided_slice %2 {offsets = [1, 0, 0], sizes = [3, 4, 32], strides = [1, 1, 1]} : vector<4x4x32xbf16> to vector<3x4x32xbf16>
    %25 = tpu.concatenate %24, %3 in 0 : vector<3x4x32xbf16>, vector<1x4x32xbf16> -> vector<4x4x32xbf16>
    %26 = vector.shape_cast %25 : vector<4x4x32xbf16> to vector<16x32xbf16>
    %27 = vector.extract_strided_slice %8 {offsets = [1, 0, 0], sizes = [3, 4, 32], strides = [1, 1, 1]} : vector<4x4x32xbf16> to vector<3x4x32xbf16>
    %28 = tpu.concatenate %27, %3 in 0 : vector<3x4x32xbf16>, vector<1x4x32xbf16> -> vector<4x4x32xbf16>
    %29 = vector.shape_cast %28 : vector<4x4x32xbf16> to vector<16x32xbf16>
    %30 = tpu.concatenate %11, %14, %17, %18, %19, %20, %23, %26, %29 in 1 : vector<16x32xbf16>, vector<16x32xbf16>, vector<16x32xbf16>, vector<16x32xbf16>, vector<16x32xbf16>, vector<16x32xbf16>, vector<16x32xbf16>, vector<16x32xbf16>, vector<16x32xbf16> -> vector<16x288xbf16>
    %c0_4 = arith.constant 0 : index
    %c0_5 = arith.constant 0 : index
    %31 = vector.load %arg3[%c0_4, %c0_5] : memref<288x64xbf16, #tpu.memory_space<vmem>>, vector<288x64xbf16>
    %cst_6 = arith.constant dense<0.000000e+00> : vector<16x64xf32>
    %32 = tpu.matmul %30, %31, %cst_6 {dimension_numbers = #tpu.dot_dimension_numbers<[1], [0], [0], [1], [0, 0, 1, 1], [], []>} : vector<16x288xbf16>, vector<288x64xbf16>, vector<16x64xf32> -> vector<16x64xf32>
    %33 = vector.extract_strided_slice %32 {offsets = [0, 0], sizes = [16, 16], strides = [1, 1]} : vector<16x64xf32> to vector<16x16xf32>
    %34 = vector.shape_cast %33 : vector<16x16xf32> to vector<4x4x16xf32>
    %35 = vector.extract_strided_slice %32 {offsets = [0, 16], sizes = [16, 16], strides = [1, 1]} : vector<16x64xf32> to vector<16x16xf32>
    %36 = vector.shape_cast %35 : vector<16x16xf32> to vector<4x4x16xf32>
    %37 = vector.extract_strided_slice %32 {offsets = [0, 32], sizes = [16, 16], strides = [1, 1]} : vector<16x64xf32> to vector<16x16xf32>
    %38 = vector.shape_cast %37 : vector<16x16xf32> to vector<4x4x16xf32>
    %39 = vector.extract_strided_slice %32 {offsets = [0, 48], sizes = [16, 16], strides = [1, 1]} : vector<16x64xf32> to vector<16x16xf32>
    %40 = vector.shape_cast %39 : vector<16x16xf32> to vector<4x4x16xf32>
    %41 = vector.shape_cast %34 : vector<4x4x16xf32> to vector<4x4x1x16xf32>
    %42 = vector.shape_cast %36 : vector<4x4x16xf32> to vector<4x4x1x16xf32>
    %43 = tpu.concatenate %41, %42 in 2 : vector<4x4x1x16xf32>, vector<4x4x1x16xf32> -> vector<4x4x2x16xf32>
    %44 = vector.shape_cast %43 : vector<4x4x2x16xf32> to vector<32x16xf32>
    %45 = vector.shape_cast %44 : vector<32x16xf32> to vector<4x8x16xf32>
    %46 = vector.shape_cast %38 : vector<4x4x16xf32> to vector<4x4x1x16xf32>
    %47 = vector.shape_cast %40 : vector<4x4x16xf32> to vector<4x4x1x16xf32>
    %48 = tpu.concatenate %46, %47 in 2 : vector<4x4x1x16xf32>, vector<4x4x1x16xf32> -> vector<4x4x2x16xf32>
    %49 = vector.shape_cast %48 : vector<4x4x2x16xf32> to vector<32x16xf32>
    %50 = vector.shape_cast %49 : vector<32x16xf32> to vector<4x8x16xf32>
    %51 = vector.shape_cast %45 : vector<4x8x16xf32> to vector<4x1x8x16xf32>
    %52 = vector.shape_cast %50 : vector<4x8x16xf32> to vector<4x1x8x16xf32>
    %53 = tpu.concatenate %51, %52 in 1 : vector<4x1x8x16xf32>, vector<4x1x8x16xf32> -> vector<4x2x8x16xf32>
    %54 = vector.shape_cast %53 : vector<4x2x8x16xf32> to vector<8x8x16xf32>
    %55 = vector.shape_cast %54 : vector<8x8x16xf32> to vector<64x16xf32>
    %c0_7 = arith.constant 0 : index
    %c0_8 = arith.constant 0 : index
    %c0_9 = arith.constant 0 : index
    %c0_10 = arith.constant 0 : index
    %56 = vector.load %arg2[%c0_7, %c0_8, %c0_9, %c0_10] : memref<1x8x8x16xf32, #tpu.memory_space<vmem>>, vector<1x8x8x16xf32>
    %57 = vector.shape_cast %56 : vector<1x8x8x16xf32> to vector<8x8x16xf32>
    %58 = arith.truncf %57 : vector<8x8x16xf32> to vector<8x8x16xbf16>
    %cst_11 = arith.constant 0.000000e+00 : bf16
    %59 = vector.broadcast %cst_11 : bf16 to vector<1x8x16xbf16>
    %cst_12 = arith.constant 0.000000e+00 : bf16
    %60 = vector.broadcast %cst_12 : bf16 to vector<8x1x16xbf16>
    %61 = vector.extract_strided_slice %58 {offsets = [0, 0, 0], sizes = [8, 7, 16], strides = [1, 1, 1]} : vector<8x8x16xbf16> to vector<8x7x16xbf16>
    %62 = tpu.concatenate %60, %61 in 1 : vector<8x1x16xbf16>, vector<8x7x16xbf16> -> vector<8x8x16xbf16>
    %63 = vector.extract_strided_slice %58 {offsets = [0, 1, 0], sizes = [8, 7, 16], strides = [1, 1, 1]} : vector<8x8x16xbf16> to vector<8x7x16xbf16>
    %64 = tpu.concatenate %63, %60 in 1 : vector<8x7x16xbf16>, vector<8x1x16xbf16> -> vector<8x8x16xbf16>
    %65 = vector.extract_strided_slice %62 {offsets = [0, 0, 0], sizes = [7, 8, 16], strides = [1, 1, 1]} : vector<8x8x16xbf16> to vector<7x8x16xbf16>
    %66 = tpu.concatenate %59, %65 in 0 : vector<1x8x16xbf16>, vector<7x8x16xbf16> -> vector<8x8x16xbf16>
    %67 = vector.shape_cast %66 : vector<8x8x16xbf16> to vector<64x16xbf16>
    %68 = vector.extract_strided_slice %58 {offsets = [0, 0, 0], sizes = [7, 8, 16], strides = [1, 1, 1]} : vector<8x8x16xbf16> to vector<7x8x16xbf16>
    %69 = tpu.concatenate %59, %68 in 0 : vector<1x8x16xbf16>, vector<7x8x16xbf16> -> vector<8x8x16xbf16>
    %70 = vector.shape_cast %69 : vector<8x8x16xbf16> to vector<64x16xbf16>
    %71 = vector.extract_strided_slice %64 {offsets = [0, 0, 0], sizes = [7, 8, 16], strides = [1, 1, 1]} : vector<8x8x16xbf16> to vector<7x8x16xbf16>
    %72 = tpu.concatenate %59, %71 in 0 : vector<1x8x16xbf16>, vector<7x8x16xbf16> -> vector<8x8x16xbf16>
    %73 = vector.shape_cast %72 : vector<8x8x16xbf16> to vector<64x16xbf16>
    %74 = vector.shape_cast %62 : vector<8x8x16xbf16> to vector<64x16xbf16>
    %75 = vector.shape_cast %58 : vector<8x8x16xbf16> to vector<64x16xbf16>
    %76 = vector.shape_cast %64 : vector<8x8x16xbf16> to vector<64x16xbf16>
    %77 = vector.extract_strided_slice %62 {offsets = [1, 0, 0], sizes = [7, 8, 16], strides = [1, 1, 1]} : vector<8x8x16xbf16> to vector<7x8x16xbf16>
    %78 = tpu.concatenate %77, %59 in 0 : vector<7x8x16xbf16>, vector<1x8x16xbf16> -> vector<8x8x16xbf16>
    %79 = vector.shape_cast %78 : vector<8x8x16xbf16> to vector<64x16xbf16>
    %80 = vector.extract_strided_slice %58 {offsets = [1, 0, 0], sizes = [7, 8, 16], strides = [1, 1, 1]} : vector<8x8x16xbf16> to vector<7x8x16xbf16>
    %81 = tpu.concatenate %80, %59 in 0 : vector<7x8x16xbf16>, vector<1x8x16xbf16> -> vector<8x8x16xbf16>
    %82 = vector.shape_cast %81 : vector<8x8x16xbf16> to vector<64x16xbf16>
    %83 = vector.extract_strided_slice %64 {offsets = [1, 0, 0], sizes = [7, 8, 16], strides = [1, 1, 1]} : vector<8x8x16xbf16> to vector<7x8x16xbf16>
    %84 = tpu.concatenate %83, %59 in 0 : vector<7x8x16xbf16>, vector<1x8x16xbf16> -> vector<8x8x16xbf16>
    %85 = vector.shape_cast %84 : vector<8x8x16xbf16> to vector<64x16xbf16>
    %86 = tpu.concatenate %67, %70, %73, %74, %75, %76, %79, %82, %85 in 1 : vector<64x16xbf16>, vector<64x16xbf16>, vector<64x16xbf16>, vector<64x16xbf16>, vector<64x16xbf16>, vector<64x16xbf16>, vector<64x16xbf16>, vector<64x16xbf16>, vector<64x16xbf16> -> vector<64x144xbf16>
    %c0_13 = arith.constant 0 : index
    %c0_14 = arith.constant 0 : index
    %87 = vector.load %arg4[%c0_13, %c0_14] : memref<144x16xbf16, #tpu.memory_space<vmem>>, vector<144x16xbf16>
    %cst_15 = arith.constant dense<0.000000e+00> : vector<64x16xf32>
    %88 = tpu.matmul %86, %87, %cst_15 {dimension_numbers = #tpu.dot_dimension_numbers<[1], [0], [0], [1], [0, 0, 1, 1], [], []>} : vector<64x144xbf16>, vector<144x16xbf16>, vector<64x16xf32> -> vector<64x16xf32>
    %89 = arith.addf %55, %88 : vector<64x16xf32>
    %c0_16 = arith.constant 0 : index
    %c0_17 = arith.constant 0 : index
    %90 = vector.load %arg5[%c0_16, %c0_17] : memref<1x16xf32, #tpu.memory_space<vmem>>, vector<1x16xf32>
    %91 = vector.shape_cast %90 : vector<1x16xf32> to vector<16xf32>
    %92 = vector.shape_cast %91 : vector<16xf32> to vector<1x16xf32>
    %93 = vector.broadcast %92 : vector<1x16xf32> to vector<64x16xf32>
    %94 = arith.addf %89, %93 : vector<64x16xf32>
    %cst_18 = arith.constant 0.000000e+00 : f32
    %95 = vector.broadcast %cst_18 : f32 to vector<64x16xf32>
    %96 = arith.maximumf %94, %95 : vector<64x16xf32>
    %97 = vector.shape_cast %96 : vector<64x16xf32> to vector<8x8x16xf32>
    %98 = arith.truncf %97 : vector<8x8x16xf32> to vector<8x8x16xbf16>
    %cst_19 = arith.constant 0.000000e+00 : bf16
    %99 = vector.broadcast %cst_19 : bf16 to vector<1x8x16xbf16>
    %cst_20 = arith.constant 0.000000e+00 : bf16
    %100 = vector.broadcast %cst_20 : bf16 to vector<8x1x16xbf16>
    %101 = vector.extract_strided_slice %98 {offsets = [0, 0, 0], sizes = [8, 7, 16], strides = [1, 1, 1]} : vector<8x8x16xbf16> to vector<8x7x16xbf16>
    %102 = tpu.concatenate %100, %101 in 1 : vector<8x1x16xbf16>, vector<8x7x16xbf16> -> vector<8x8x16xbf16>
    %103 = vector.extract_strided_slice %98 {offsets = [0, 1, 0], sizes = [8, 7, 16], strides = [1, 1, 1]} : vector<8x8x16xbf16> to vector<8x7x16xbf16>
    %104 = tpu.concatenate %103, %100 in 1 : vector<8x7x16xbf16>, vector<8x1x16xbf16> -> vector<8x8x16xbf16>
    %105 = vector.extract_strided_slice %102 {offsets = [0, 0, 0], sizes = [7, 8, 16], strides = [1, 1, 1]} : vector<8x8x16xbf16> to vector<7x8x16xbf16>
    %106 = tpu.concatenate %99, %105 in 0 : vector<1x8x16xbf16>, vector<7x8x16xbf16> -> vector<8x8x16xbf16>
    %107 = vector.shape_cast %106 : vector<8x8x16xbf16> to vector<64x16xbf16>
    %108 = vector.extract_strided_slice %98 {offsets = [0, 0, 0], sizes = [7, 8, 16], strides = [1, 1, 1]} : vector<8x8x16xbf16> to vector<7x8x16xbf16>
    %109 = tpu.concatenate %99, %108 in 0 : vector<1x8x16xbf16>, vector<7x8x16xbf16> -> vector<8x8x16xbf16>
    %110 = vector.shape_cast %109 : vector<8x8x16xbf16> to vector<64x16xbf16>
    %111 = vector.extract_strided_slice %104 {offsets = [0, 0, 0], sizes = [7, 8, 16], strides = [1, 1, 1]} : vector<8x8x16xbf16> to vector<7x8x16xbf16>
    %112 = tpu.concatenate %99, %111 in 0 : vector<1x8x16xbf16>, vector<7x8x16xbf16> -> vector<8x8x16xbf16>
    %113 = vector.shape_cast %112 : vector<8x8x16xbf16> to vector<64x16xbf16>
    %114 = vector.shape_cast %102 : vector<8x8x16xbf16> to vector<64x16xbf16>
    %115 = vector.shape_cast %98 : vector<8x8x16xbf16> to vector<64x16xbf16>
    %116 = vector.shape_cast %104 : vector<8x8x16xbf16> to vector<64x16xbf16>
    %117 = vector.extract_strided_slice %102 {offsets = [1, 0, 0], sizes = [7, 8, 16], strides = [1, 1, 1]} : vector<8x8x16xbf16> to vector<7x8x16xbf16>
    %118 = tpu.concatenate %117, %99 in 0 : vector<7x8x16xbf16>, vector<1x8x16xbf16> -> vector<8x8x16xbf16>
    %119 = vector.shape_cast %118 : vector<8x8x16xbf16> to vector<64x16xbf16>
    %120 = vector.extract_strided_slice %98 {offsets = [1, 0, 0], sizes = [7, 8, 16], strides = [1, 1, 1]} : vector<8x8x16xbf16> to vector<7x8x16xbf16>
    %121 = tpu.concatenate %120, %99 in 0 : vector<7x8x16xbf16>, vector<1x8x16xbf16> -> vector<8x8x16xbf16>
    %122 = vector.shape_cast %121 : vector<8x8x16xbf16> to vector<64x16xbf16>
    %123 = vector.extract_strided_slice %104 {offsets = [1, 0, 0], sizes = [7, 8, 16], strides = [1, 1, 1]} : vector<8x8x16xbf16> to vector<7x8x16xbf16>
    %124 = tpu.concatenate %123, %99 in 0 : vector<7x8x16xbf16>, vector<1x8x16xbf16> -> vector<8x8x16xbf16>
    %125 = vector.shape_cast %124 : vector<8x8x16xbf16> to vector<64x16xbf16>
    %126 = tpu.concatenate %107, %110, %113, %114, %115, %116, %119, %122, %125 in 1 : vector<64x16xbf16>, vector<64x16xbf16>, vector<64x16xbf16>, vector<64x16xbf16>, vector<64x16xbf16>, vector<64x16xbf16>, vector<64x16xbf16>, vector<64x16xbf16>, vector<64x16xbf16> -> vector<64x144xbf16>
    %c0_21 = arith.constant 0 : index
    %c0_22 = arith.constant 0 : index
    %127 = vector.load %arg6[%c0_21, %c0_22] : memref<144x16xbf16, #tpu.memory_space<vmem>>, vector<144x16xbf16>
    %cst_23 = arith.constant dense<0.000000e+00> : vector<64x16xf32>
    %128 = tpu.matmul %126, %127, %cst_23 {dimension_numbers = #tpu.dot_dimension_numbers<[1], [0], [0], [1], [0, 0, 1, 1], [], []>} : vector<64x144xbf16>, vector<144x16xbf16>, vector<64x16xf32> -> vector<64x16xf32>
    %c0_24 = arith.constant 0 : index
    %c0_25 = arith.constant 0 : index
    %129 = vector.load %arg7[%c0_24, %c0_25] : memref<1x16xf32, #tpu.memory_space<vmem>>, vector<1x16xf32>
    %130 = vector.shape_cast %129 : vector<1x16xf32> to vector<16xf32>
    %131 = vector.shape_cast %130 : vector<16xf32> to vector<1x16xf32>
    %132 = vector.broadcast %131 : vector<1x16xf32> to vector<64x16xf32>
    %133 = arith.addf %128, %132 : vector<64x16xf32>
    %cst_26 = arith.constant 0.000000e+00 : f32
    %134 = vector.broadcast %cst_26 : f32 to vector<64x16xf32>
    %135 = arith.maximumf %133, %134 : vector<64x16xf32>
    %136 = vector.shape_cast %135 : vector<64x16xf32> to vector<1x8x8x16xf32>
    %137 = arith.truncf %136 : vector<1x8x8x16xf32> to vector<1x8x8x16xbf16>
    %c0_27 = arith.constant 0 : index
    %c0_28 = arith.constant 0 : index
    %c0_29 = arith.constant 0 : index
    %c0_30 = arith.constant 0 : index
    %138 = vector.load %arg8[%c0_27, %c0_28, %c0_29, %c0_30] : memref<1x8x8x16xbf16, #tpu.memory_space<vmem>>, vector<1x8x8x16xbf16>
    tpu.vector_store %arg8[%c0_27, %c0_28, %c0_29, %c0_30], %137 {strides = array<i32>} : memref<1x8x8x16xbf16, #tpu.memory_space<vmem>>, vector<1x8x8x16xbf16>,
    return
  }
  func.func @transform_0(%arg0: i32) -> (i32, i32, i32, i32) {
    %c0_i32 = arith.constant 0 : i32
    %c0_i32_0 = arith.constant 0 : i32
    %c0_i32_1 = arith.constant 0 : i32
    %c0_i32_2 = arith.constant 0 : i32
    return %arg0, %c0_i32, %c0_i32_0, %c0_i32_1 : i32, i32, i32, i32
  }
  func.func @transform_1(%arg0: i32) -> (i32, i32, i32, i32) {
    %c0_i32 = arith.constant 0 : i32
    %c0_i32_0 = arith.constant 0 : i32
    %c0_i32_1 = arith.constant 0 : i32
    %c0_i32_2 = arith.constant 0 : i32
    return %arg0, %c0_i32, %c0_i32_0, %c0_i32_1 : i32, i32, i32, i32
  }
  func.func @transform_2(%arg0: i32) -> (i32, i32) {
    %c0_i32 = arith.constant 0 : i32
    %c0_i32_0 = arith.constant 0 : i32
    %c0_i32_1 = arith.constant 0 : i32
    return %c0_i32, %c0_i32_0 : i32, i32
  }
  func.func @transform_3(%arg0: i32) -> (i32, i32) {
    %c0_i32 = arith.constant 0 : i32
    %c0_i32_0 = arith.constant 0 : i32
    %c0_i32_1 = arith.constant 0 : i32
    return %c0_i32, %c0_i32_0 : i32, i32
  }
  func.func @transform_4(%arg0: i32) -> (i32, i32) {
    %c0_i32 = arith.constant 0 : i32
    %c0_i32_0 = arith.constant 0 : i32
    %c0_i32_1 = arith.constant 0 : i32
    return %c0_i32, %c0_i32_0 : i32, i32
  }
  func.func @transform_5(%arg0: i32) -> (i32, i32) {
    %c0_i32 = arith.constant 0 : i32
    %c0_i32_0 = arith.constant 0 : i32
    %c0_i32_1 = arith.constant 0 : i32
    return %c0_i32, %c0_i32_0 : i32, i32
  }
  func.func @transform_6(%arg0: i32) -> (i32, i32) {
    %c0_i32 = arith.constant 0 : i32
    %c0_i32_0 = arith.constant 0 : i32
    %c0_i32_1 = arith.constant 0 : i32
    return %c0_i32, %c0_i32_0 : i32, i32
  }
  func.func @transform_7(%arg0: i32) -> (i32, i32, i32, i32) {
    %c0_i32 = arith.constant 0 : i32
    %c0_i32_0 = arith.constant 0 : i32
    %c0_i32_1 = arith.constant 0 : i32
    %c0_i32_2 = arith.constant 0 : i32
    return %arg0, %c0_i32, %c0_i32_0, %c0_i32_1 : i32, i32, i32, i32
  }
}

</mosaic_0001>

<bundles_post_ra>
// kernel: tpu_custom_call.1
= control target key start
LH: loop header
LB: loop body
LE: loop exit
PB: predicated region body
PF: predicated region fallthrough
CT: control target
= control target key end

     0   :  { %12 = vsyncpa [#allocation3], 0  ;;  %s4069_s0 = inlined_call_operand.vmem [shape: f32[2,4,4,32], index: 0, kind: input, shape index: {}]   ;;  %s4070_s1 = inlined_call_operand.vmem [shape: f32[2,8,8,16], index: 1, kind: input, shape index: {}]   ;;  %s4071_s2 = inlined_call_operand.vmem [shape: bf16[288,64], index: 2, kind: input, shape index: {}]   ;;  %s4072_s3 = inlined_call_operand.vmem [shape: bf16[144,16], index: 3, kind: input, shape index: {}]   ;;  %s4073_s4 = inlined_call_operand.vmem [shape: f32[1,16], index: 4, kind: input, shape index: {}]   ;;  %s4074_s5 = inlined_call_operand.vmem [shape: bf16[144,16], index: 5, kind: input, shape index: {}]   ;;  %s4075_s6 = inlined_call_operand.vmem [shape: f32[1,16], index: 6, kind: input, shape index: {}]   ;;  %s4076_s7 = inlined_call_operand.hbm [shape: bf16[2,8,8,16], index: 7, kind: output, shape index: {}]  }
   0x1   :  { %14 = vsyncpa [#allocation3 + $0x1], 0  ;;  %s2990_s24 = smov 0   ;;  %s2992_s25 = smov 0  }
   0x2   :  { %s2994_s26 = smov 0   ;;  %s2996_s27 = smov 0  }
   0x3 LB: > { %s3011_s28 = sadd.s32 4294967295, %s2934_s27   ;;  %s2598_s29 = sadd.s32 4294967294, %s2934_s27   ;;  %s2934_s27 = sphi %s2996_s27, %s4088_s27   ;;  %s2930_s26 = sphi %s2994_s26, %s4087_s26   ;;  %s2926_s25 = sphi %s2992_s25, %s4086_s25   ;;  %s2922_s24 = sphi %s2990_s24, %s4085_s24  }
   0x4   : > { %s3015_s30 = sadd.s32 1, %s2934_s27   ;;  %s184_s8 = sadd.s32 1, %s2930_s26 }
   0x5   : > { %s181_s9 = ssub.s32 %s2934_s27, %s3015_s30  ;;  %p194_p0 = scmp.ne.s32.totalorder %s2930_s26, %s2926_s25 }
   0x6   : > { %p182_p1 = scmp.eq.s32.totalorder %s181_s9, 0  ;;  %p195_p2 = scmp.eq.s32.totalorder %s3011_s28, 1 }
   0x7   : > { %p200_p3 = scmp.ne.s32.totalorder %s2926_s25, %s2922_s24  ;;  %p201_p4 = scmp.eq.s32.totalorder %s2598_s29, 1 }
   0x8   : > { %s3026_s10 = scalar_select %p182_p1, %s2930_s26, %s184_s8  }
   0x9   : > { %p3028_p5 = por %p195_p2, %p194_p0  ;;  %p3032_p6 = por %p201_p4, %p200_p3 }
   0xa   : > { %p2601_p7 = scmp.ge.s32.totalorder %s2934_s27, 1  ;;  %p250_p8 = scmp.lt.s32.totalorder %s2934_s27, 3 }
   0xc   : > { %p251_p9 = pnand %p2601_p7, %p250_p8 }
   0xd   : > { %p287_p10 = scmp.lt.s32.totalorder (!%p251_p9), %s3011_s28, 1  ;;  %v373_v0 = vlaneseq (!%p251_p9)  ;;  %v2936_v1 = vmov (!%p251_p9), 1983009808   ;;  %vm339_vm0 = vsmask.f32 (!%p251_p9), 256  ;;  %v2836_v5 = vld [vmem:[%s4071_s2 + $0x40] sm:$0xff] (!%p251_p9)  }
   0xe   : > { %254 = sbr.rel (%p251_p9) target bundleno = 1049 (0x419), region = 48  ;;  %v371_v2 = vunpack.c.l.s4 (!%p251_p9), %v2936_v1  ;;  %vm358_vm1 = vsmask.f32 (!%p251_p9), 1280  ;;  %vm338_vm2 = vcmask (!%p251_p9), 1040384   ;;  %v2837_v6 = vld [vmem:[%s4071_s2] sm:$0xff] (!%p251_p9)   ;;  %v2838_v7 = vld [vmem:[%s4071_s2 + $0x48] sm:$0xff] (!%p251_p9)   ;;  %2733 = vmatprep.subr.bf16.mxu0 (!%p251_p9), %v2836_v5 }
   0xf   : > { %v3042_v3 = vshrl.u32 (!%p251_p9), %v373_v0, 7  ;;  %2734 = vmatpush3.bf16.msra.mxu0 (!%p251_p9), %v2837_v6  ;;  %v2839_v17 = vld [vmem:[%s4071_s2 + $0x8] sm:$0xff] (!%p251_p9)   ;;  %vm357_vm3 = vcmask (!%p251_p9), 1041408   ;;  %v2840_v21 = vld [vmem:[%s4071_s2 + $0x50] sm:$0xff] (!%p251_p9)   ;;  %v2937_v24 = vmov (!%p251_p9), 0   ;;  %v2842_v36 = vld [vmem:[%s4071_s2 + $0x58] sm:$0xff] (!%p251_p9)  }
  0x10   : > { %v372_v4 = vunpack.c.0.s8 (!%p251_p9), %v371_v2  ;;  %2735 = vmatprep.subr.bf16.mxu0 (!%p251_p9), %v2838_v7  ;;  %v2841_v31 = vld [vmem:[%s4071_s2 + $0x10] sm:$0xff] (!%p251_p9)   ;;  %vm3105_vm4 = vmand (!%p251_p9), %vm338_vm2, %vm339_vm0  ;;  %v2843_v51 = vld [vmem:[%s4071_s2 + $0x18] sm:$0xff] (!%p251_p9)   ;;  %s2939_s20 = smov (!%p251_p9), 64   ;;  %vm1187_vm6 = vcmask (!%p251_p9), 1043456   ;;  %vm1188_vm7 = vsmask.f32 (!%p251_p9), 3328 }
  0x11   : > { %vm3113_vm5 = vmand (!%p251_p9), %vm357_vm3, %vm358_vm1  ;;  %v2844_v56 = vld [vmem:[%s4071_s2 + $0x60] sm:$0xff] (!%p251_p9)   ;;  %vm2943_vm9 = vmmov (!%p251_p9), 0   ;;  %vm518_vm10 = vcmask (!%p251_p9), 261120   ;;  %s2944_s14 = smov (!%p251_p9), 48   ;;  %s2945_s17 = smov (!%p251_p9), 80   ;;  %vm1330_vm11 = vcmask (!%p251_p9), 130048  }
  0x12   : > { %v3058_v8 = vsub.s32 (!%p251_p9), %v372_v4, %v3042_v3  ;;  %v2845_v1 = vld [vmem:[%s4071_s2 + $0x20] sm:$0xff] (!%p251_p9)   ;;  %vm3224_vm8 = vmand (!%p251_p9), %vm1187_vm6, %vm1188_vm7  ;;  %s2946_s22 = smov (!%p251_p9), 112   ;;  %vm522_vm12 = vcmask (!%p251_p9), 523264   ;;  %vm525_vm13 = vcmask (!%p251_p9), 785408   ;;  %vm1351_vm14 = vcmask (!%p251_p9), 392192   ;;  %s2948_s15 = smov (!%p251_p9), [#allocation2]  }
  0x13   : > { %2736 = vmatpush3.bf16.msra.mxu0 (!%p251_p9), %v2839_v17  ;;  %vm1368_vm15 = vcmask (!%p251_p9), 654336   ;;  %vm1385_vm0 = vcmask (!%p251_p9), 916480   ;;  %vm2501_vm1 = vcmask (!%p251_p9), 125952  }
  0x14   : > { %2737 = vmatprep.subr.bf16.mxu0 (!%p251_p9), %v2840_v21 }
  0x15   : > { %s3040_s13 = scalar_select %p287_p10, %s3011_s28, 1 }
  0x17   : > { %s2716_s16 = sshll.u32 %s3040_s13, 4  ;;  %s2717_s19 = sshll.u32 %s3040_s13, 6  ;;  %2738 = vmatpush3.bf16.msra.mxu0 %v2841_v31 }
  0x18   : > { %s291_s23 = scalar_lea.vmem %s4069_s0, %s2716_s16  ;;  %s2938_s13 = smov 32   ;;  %2739 = vmatprep.subr.bf16.mxu0 %v2842_v36 }
  0x19   : > { %v3060_v9 = vld [vmem:[%s291_s23] sm:$0xf]  ;;  %v3062_v10 = vld [vmem:[%s291_s23 + $0x4] sm:$0xf]  ;;  %v3064_v11 = vld [vmem:[%s291_s23 + $0x8] sm:$0xf]  ;;  %s3133_s9 = scalar_lea.vmem %s4070_s1, %s2717_s19 }
  0x1a   : > { %v3066_v12 = vld [vmem:[%s291_s23 + $0xc] sm:$0xf]  ;;  %v3070_v13 = vpack.c.bf16 %v3060_v9, %v3060_v9  ;;  %v303_v14 = vpack.c.bf16 %v3062_v10, %v3062_v10  ;;  %v304_v15 = vpack.c.bf16 %v3064_v11, %v3064_v11  ;;  %v2607_v16 = vpack.c.bf16 %v3064_v11, %v3062_v10  ;;  %s2941_s19 = smov 96   ;;  %s2942_s23 = smov 16  }
  0x1b   : > { %v305_v18 = vpack.c.bf16 %v3066_v12, %v3066_v12  ;;  %v2608_v19 = vpack.c.bf16 %v3062_v10, %v3060_v9  ;;  %v2609_v20 = vpack.c.bf16 %v3066_v12, %v3064_v11  ;;  %2740 = vmatpush3.bf16.msra.mxu0 %v2843_v51  ;;  %v2849_v51 = vld [vmem:[%s4071_s2 + $0x30] sm:$0xff]   ;;  %s2876_s16 = sshll.u32 %s2948_s15, 4  ;;  %s2877_s16 = int_to_ptr.vmem [resolvable:$false] %s2876_s16 }
  0x1c   : > { %v314_v22 = vshrl.u32 %v303_v14, 16  ;;  %v321_v23 = vshrl.u32 %v304_v15, 16  ;;  %v388_v25 = vcombine.low %v2937_v24, %v3070_v13  ;;  %v3093_v26 = vrot.slane %v2607_v16, %v3058_v8  ;;  %v3156_v16 = vld [vmem:[%s3133_s9] sm:$0xff]  ;;  %2741 = vmatprep.subr.bf16.mxu0 %v2844_v56  ;;  %v2851_v56 = vld [vmem:[%s4071_s2 + $0x78] sm:$0xff]  }
  0x1d   : > { %v317_v27 = vshll.u32 %v303_v14, 16  ;;  %v324_v28 = vshll.u32 %v304_v15, 16  ;;  %v328_v29 = vshrl.u32 %v305_v18, 16  ;;  %v331_v30 = vshll.u32 %v305_v18, 16 }
  0x1e   : > { %v396_v32 = vrot.slane %v388_v25, %v3058_v8  ;;  %v316_v33 = vrot.slane %v314_v22, 7  ;;  %v323_v34 = vrot.slane %v321_v23, 7  ;;  %v307_v35 = vshrl.u32 %v3070_v13, 16 }
  0x1f   : > { %v330_v37 = vrot.slane %v328_v29, 7  ;;  %v347_v39 = vrot.slane %v317_v27, 1  ;;  %v349_v40 = vrot.slane %v324_v28, 1  ;;  %v351_v41 = vrot.slane %v331_v30, 1  ;;  %2742 = vmatpush3.bf16.msra.mxu0 %v2845_v1 }
  0x20   : > { %v404_v42 = vcombine.low %v396_v32, %v3093_v26  ;;  %v319_v43 = vor.u32 %v317_v27, %v316_v33  ;;  %v326_v44 = vor.u32 %v324_v28, %v323_v34  ;;  %v309_v45 = vrot.slane %v307_v35, 7  ;;  %v2847_v33 = vld [vmem:[%s4071_s2 + $0x28] sm:$0xff]  }
  0x21   : > { %v333_v47 = vor.u32 %v331_v30, %v330_v37  ;;  %v310_v48 = vshll.u32 %v3070_v13, 16  ;;  %v348_v49 = vor.u32 %v347_v39, %v314_v22  ;;  %v350_v50 = vor.u32 %v349_v40, %v321_v23  ;;  %v2846_v22 = vld [vmem:[%s4071_s2 + $0x68] sm:$0xff]   ;;  %v2848_v39 = vld [vmem:[%s4071_s2 + $0x70] sm:$0xff]  }
  0x22   : > { %405 = vrot.lane.b32.xlu0 %v404_v42, %s2938_s13  ;;  %v342_v52 = vsel %vm3105_vm4, 0, %v319_v43  ;;  %v343_v53 = vsel %vm3105_vm4, 0, %v326_v44  ;;  %v352_v54 = vor.u32 %v351_v41, %v328_v29  ;;  %v498_v55 = vcombine.low %v305_v18, %v2937_v24  ;;  %v3167_v29 = vld [vmem:[%s3133_s9 + $0x8] sm:$0xff]  ;;  %2743 = vmatprep.subr.bf16.mxu0 %v2846_v22  ;;  %v3191_v42 = vld [vmem:[%s3133_s9 + $0x10] sm:$0xff] }
  0x23   : > { %v344_v57 = vsel %vm3105_vm4, 0, %v333_v47  ;;  %v369_v58 = vcombine.low %v342_v52, %v343_v53  ;;  %v312_v59 = vor.u32 %v310_v48, %v309_v45  ;;  %v345_v60 = vrot.slane %v310_v48, 1  ;;  %2744 = vmatpush3.bf16.msra.mxu0 %v2847_v33 }
  0x24   : > { %v431_v61 = vcombine.low %v343_v53, %v344_v57  ;;  %v487_v62 = vcombine.low %v344_v57, %v2937_v24  ;;  %v361_v63 = vsel %vm3113_vm5, %v348_v49, 0  ;;  %v362_v0 = vsel %vm3113_vm5, %v350_v50, 0  ;;  %2745 = vmatprep.subr.bf16.mxu0 %v2848_v39 }
  0x25   : > { %v383_v2 = vrot.slane %v369_v58, %v3058_v8  ;;  %v341_v4 = vsel %vm3105_vm4, 0, %v312_v59  ;;  %v346_v5 = vor.u32 %v345_v60, %v307_v35  ;;  %v3150_v6 = vsel %vm3113_vm5, %v352_v54, 0  ;;  %v2852_v60 = vld [vmem:[%s4071_s2 + $0x38] sm:$0xff]  }
  0x26   : > { %v494_v7 = vrot.slane %v487_v62, %v3058_v8  ;;  %v368_v13 = vcombine.low %v2937_v24, %v341_v4  ;;  %v430_v14 = vcombine.low %v341_v4, %v342_v52  ;;  %v469_v15 = vcombine.low %v362_v0, %v3150_v6  ;;  %v3243_v4 = vld [vmem:[%s3133_s9 + $0x18] sm:$0xff] }
  0x27   : > { %v360_v17 = vsel %vm3113_vm5, %v346_v5, 0  ;;  %v505_v18 = vrot.slane %v498_v55, %v3058_v8  ;;  %v411_v21 = vcombine.low %v361_v63, %v362_v0  ;;  %v445_v36 = vrot.slane %v431_v61, %v3058_v8  ;;  %v2850_v55 = vld [vmem:[%s4071_s2 + $0x80] sm:$0xff]   ;;  %2746 = vmatpush3.bf16.msra.mxu0 %v2849_v51 }
  0x28   : > { %v495_v23 = vcombine.low %v383_v2, %v494_v7  ;;  %v376_v25 = vrot.slane %v368_v13, %v3058_v8  ;;  %v468_v27 = vcombine.low %v360_v17, %v361_v63  ;;  %v483_v28 = vrot.slane %v469_v15, %v3058_v8  ;;  %2747 = vmatprep.subr.bf16.mxu0 %v2851_v56 }
  0x29   : > { %v410_v30 = vcombine.low %v2937_v24, %v360_v17  ;;  %v3171_v31 = vrot.slane %v411_v21, %v3058_v8  ;;  %v438_v32 = vrot.slane %v430_v14, %v3058_v8  ;;  %v1083_v37 = vpack.c.bf16 %v3156_v16, %v3156_v16  ;;  %v3255_v14 = vld [vmem:[%s3133_s9 + $0x20] sm:$0xff] }
  0x2a   : > { %496 = vrot.lane.b32.xlu1 %v495_v23, %s2939_s20  ;;  %v3178_v34 = vcombine.low %v376_v25, %v383_v2  ;;  %v476_v35 = vrot.slane %v468_v27, %v3058_v8  ;;  %v1084_v41 = vpack.c.bf16 %v3167_v29, %v3167_v29  ;;  %v506_v44 = vcombine.low %v3093_v26, %v505_v18  ;;  %v2853_v2 = vld [vmem:[%s4071_s2 + $0x88] sm:$0xff]  }
  0x2b   : > { %v418_v40 = vrot.slane %v410_v30, %v3058_v8  ;;  %v446_v45 = vcombine.low %v438_v32, %v445_v36  ;;  %v1092_v46 = vshrl.u32 %v1083_v37, 16  ;;  %v1095_v48 = vshll.u32 %v1083_v37, 16  ;;  %2748 = vmatpush3.bf16.msra.mxu0 %v2852_v60  ;;  %v2854_v32 = vld [vmem:[%s4072_s3] sm:$0xff]  }
  0x2c   : > { %v484_v43 = vcombine.low %v476_v35, %v483_v28  ;;  %v1099_v49 = vshrl.u32 %v1084_v41, 16  ;;  %v1102_v50 = vshll.u32 %v1084_v41, 16  ;;  %v3201_v53 = vpack.c.bf16 %v3191_v42, %v3191_v42  ;;  %2420 = vmatprep.subr.bf16.mxu0 %v2937_v24 }
  0x2d   : > { %v426_v47 = vcombine.low %v418_v40, %v3171_v31  ;;  %v1094_v52 = vrot.slane %v1092_v46, 7  ;;  %v3207_v26 = vrot.slane %v2608_v19, %v3058_v8  ;;  %v3213_v54 = vrot.slane %v2609_v20, %v3058_v8 }
  0x2e   : > { %485 = vrot.lane.b32.xlu0 %v484_v43, %s2938_s13  ;;  %v1163_v9 = vrot.slane %v1095_v48, 1  ;;  %v1101_v10 = vrot.slane %v1099_v49, 7  ;;  %v1165_v19 = vrot.slane %v1102_v50, 1  ;;  %v1106_v20 = vshrl.u32 %v3201_v53, 16 }
  0x2f   : > { %427 = vrot.lane.b32.xlu1 %v426_v47, %s2939_s20  ;;  %v1097_v12 = vor.u32 %v1095_v48, %v1094_v52  ;;  %v1109_v57 = vshll.u32 %v3201_v53, 16  ;;  %v466_v58 = vcombine.low %v3207_v26, %v3213_v54  ;;  %v2940_v59 = vmov 0.0  }
  0x30   : > { %2758 = vmatprep.subr.bf16.mxu1 %v2940_v59  ;;  %v1164_v61 = vor.u32 %v1163_v9, %v1092_v46  ;;  %v1104_v62 = vor.u32 %v1102_v50, %v1101_v10  ;;  %v509_v63 = vcombine.low %v3150_v6, %v2937_v24  ;;  %v2633_v0 = vcombine.low %v2937_v24, %v1083_v37 }
  0x31   : > { %v1108_v1 = vrot.slane %v1106_v20, 7  ;;  %2759 = vmatpush3.bf16.msra.mxu1 %v2850_v55  ;;  %v3250_v6 = vsel %vm3105_vm4, 0, %v1097_v12  ;;  %v1166_v13 = vor.u32 %v1165_v19, %v1099_v49  ;;  %v1086_v18 = vpack.c.bf16 %v3243_v4, %v3243_v4  ;;  %2762 = vmatprep.mubr.msk.bf16.mxu1 %vm2943_vm9, %v2940_v59  ;;  %v3309_v55 = vld [vmem:[%s3133_s9 + $0x30] sm:$0xff] }
  0x32   : > { %507 = vrot.lane.b32.xlu0 %v506_v44, %s2941_s19  ;;  %v1190_v5 = vsel %vm3224_vm8, %v1164_v61, 0  ;;  %v1156_v7 = vsel %vm3105_vm4, 0, %v1104_v62  ;;  %2760 = vmatprep.subr.bf16.mxu1 %v2940_v59  ;;  %v1167_v22 = vrot.slane %v1109_v57, 1  ;;  %v516_v23 = vrot.slane %v509_v63, %v3058_v8 }
  0x33   : > { %447 = vrot.lane.b32.xlu1 %v446_v45, %s2941_s19  ;;  %v2637_v15 = vcombine.low %v2937_v24, %v1190_v5  ;;  %v1111_v17 = vor.u32 %v1109_v57, %v1108_v1  ;;  %v2641_v21 = vcombine.low %v3250_v6, %v1156_v7  ;;  %v3265_v25 = vpack.c.bf16 %v3255_v14, %v3255_v14  ;;  %v2855_v45 = vld [vmem:[%s4072_s3 + $0x8] sm:$0xff]   ;;  %v2857_v57 = vld [vmem:[%s4072_s3 + $0x18] sm:$0xff]  }
  0x34   : > { %v2721_v27 = vpack.c.bf16 %v3167_v29, %v3156_v16  ;;  %v1191_v28 = vsel %vm3224_vm8, %v1166_v13, 0  ;;  %v1113_v30 = vshrl.u32 %v1086_v18, 16  ;;  %v1116_v35 = vshll.u32 %v1086_v18, 16 }
  0x35   : > { %2761 = vmatpush3.bf16.msra.mxu1 %v2853_v2  ;;  %v1157_v33 = vsel %vm3105_vm4, 0, %v1111_v17  ;;  %v517_v36 = vcombine.low %v3171_v31, %v516_v23  ;;  %v2649_v37 = vcombine.low %v1190_v5, %v1191_v28  ;;  %v1168_v39 = vor.u32 %v1167_v22, %v1106_v20  ;;  %v3287_v31 = vld [vmem:[%s3133_s9 + $0x28] sm:$0xff]  ;;  %v2858_v2 = vld [vmem:[%s4072_s3 + $0x20] sm:$0xff]   ;;  %v3333_v5 = vld [vmem:[%s3133_s9 + $0x38] sm:$0xff] }
  0x36   : > { %1235 = vrot.lane.b32.xlu0 %v2633_v0, %s2942_s23  ;;  %1482 = vmatprep.subr.bf16.mxu1 %v2937_v24  ;;  %v1115_v16 = vrot.slane %v1113_v30, 7  ;;  %v1120_v40 = vshrl.u32 %v3265_v25, 16  ;;  %v3284_v41 = vcombine.low %v1156_v7, %v1157_v33  ;;  %v1169_v44 = vrot.slane %v1116_v35, 1  ;;  %v2859_v23 = vld [vmem:[%s4072_s3 + $0x28] sm:$0xff]  }
  0x37   : > { %1261 = vrot.lane.b32.xlu1 %v2637_v15, %s2938_s13  ;;  %v2718_v46 = vpack.c.bf16 %v3191_v42, %v3167_v29  ;;  %v1192_v47 = vsel %vm3224_vm8, %v1168_v39, 0  ;;  %v1123_v49 = vshll.u32 %v3265_v25, 16  ;;  %v1088_v50 = vpack.c.bf16 %v3287_v31, %v3287_v31  ;;  %v2856_v29 = vld [vmem:[%s4072_s3 + $0x10] sm:$0xff]  }
  0x38   : > { %2763 = vmatmul.mubr.msk.bf16.vlgmr.msra.gmra.mrb[0].mxu1 %vm518_vm10, %v517_v36  ;;  %v1118_v43 = vor.u32 %v1116_v35, %v1115_v16  ;;  %v1122_v48 = vrot.slane %v1120_v40, 7  ;;  %v1170_v52 = vor.u32 %v1169_v44, %v1113_v30  ;;  %v2638_v53 = vcombine.low %v1191_v28, %v1192_v47 }
  0x39   : > { %1483 = vmatpush1.bf16.msra.mxu1 %v2854_v32  ;;  %v1127_v10 = vshrl.u32 %v1088_v50, 16  ;;  %v1171_v12 = vrot.slane %v1123_v49, 1  ;;  %v1089_v20 = vpack.c.bf16 %v3309_v55, %v3309_v55  ;;  %v2722_v59 = vpack.c.bf16 %v3243_v4, %v3191_v42  ;;  %v2860_v32 = vld [vmem:[%s4072_s3 + $0x30] sm:$0xff]  }
  0x3a   : > { %1275 = vrot.lane.b32.xlu0 %v2641_v21, %s2944_s14  ;;  %1484 = vmatprep.subr.bf16.mxu1 %v2937_v24  ;;  %v1158_v51 = vsel %vm3105_vm4, 0, %v1118_v43  ;;  %v1125_v9 = vor.u32 %v1123_v49, %v1122_v48  ;;  %v1193_v19 = vsel %vm3224_vm8, %v1170_v52, 0  ;;  %v1130_v63 = vshll.u32 %v1088_v50, 16  ;;  %v2861_v43 = vld [vmem:[%s4072_s3 + $0x38] sm:$0xff]   ;;  %v2862_v48 = vld [vmem:[%s4072_s3 + $0x40] sm:$0xff]  }
  0x3b   : > { %1289 = vrot.lane.b32.xlu1 %v2721_v27, %s2939_s20  ;;  %v2642_v56 = vcombine.low %v1157_v33, %v1158_v51  ;;  %2665 = vmatprep.mubr.msk.bf16.mxu1 %vm1330_vm11, %v2638_v53  ;;  %v2650_v60 = vcombine.low %v1192_v47, %v1193_v19  ;;  %v1129_v62 = vrot.slane %v1127_v10, 7  ;;  %v1172_v0 = vor.u32 %v1171_v12, %v1120_v40 }
  0x3c   : > { %v1159_v61 = vsel %vm3105_vm4, 0, %v1125_v9  ;;  %v1134_v1 = vshrl.u32 %v1089_v20, 16  ;;  %v2719_v7 = vpack.c.bf16 %v3255_v14, %v3243_v4  ;;  %v1173_v15 = vrot.slane %v1130_v63, 1 }
  0x3d   : > { %1485 = vmatpush1.bf16.msra.mxu1 %v2855_v45  ;;  %v3337_v42 = vcombine.low %v1158_v51, %v1159_v61  ;;  %v1132_v13 = vor.u32 %v1130_v63, %v1129_v62  ;;  %v1194_v17 = vsel %vm3224_vm8, %v1172_v0, 0  ;;  %v1137_v21 = vshll.u32 %v1089_v20, 16 }
  0x3e   : > { %1303 = vrot.lane.b32.xlu0 %v2649_v37, %s2945_s17  ;;  %1486 = vmatprep.subr.bf16.mxu1 %v2937_v24  ;;  %v1136_v18 = vrot.slane %v1134_v1, 7  ;;  %v1090_v22 = vpack.c.bf16 %v3333_v5, %v3333_v5  ;;  %v3353_v4 = vcombine.low %v1193_v19, %v1194_v17  ;;  %v1174_v27 = vor.u32 %v1173_v15, %v1127_v10 }
  0x3f   : > { %1312 = vrot.lane.b32.xlu1 %v3284_v41, %s2941_s19  ;;  %v1160_v25 = vsel %vm3105_vm4, 0, %v1132_v13  ;;  %v2723_v35 = vpack.c.bf16 %v3287_v31, %v3255_v14  ;;  %v1175_v16 = vrot.slane %v1137_v21, 1  ;;  %v2720_v49 = vpack.c.bf16 %v3309_v55, %v3287_v31 }
  0x40   : > { %v1139_v28 = vor.u32 %v1137_v21, %v1136_v18  ;;  %v1141_v30 = vshrl.u32 %v1090_v22, 16  ;;  %v2643_v33 = vcombine.low %v1159_v61, %v1160_v25  ;;  %v1195_v36 = vsel %vm3224_vm8, %v1174_v27, 0 }
  0x41   : > { %1487 = vmatpush1.bf16.msra.mxu1 %v2856_v29  ;;  %v1144_v40 = vshll.u32 %v1090_v22, 16  ;;  %v2651_v44 = vcombine.low %v1194_v17, %v1195_v36  ;;  %v1176_v45 = vor.u32 %v1175_v16, %v1134_v1  ;;  %v2654_v19 = vcombine.low %v1090_v22, %v2937_v24 }
  0x42   : > { %1321 = vrot.lane.b32.xlu0 %v2718_v46, %s2946_s22  ;;  %1488 = vmatprep.subr.bf16.mxu1 %v2937_v24  ;;  %v1161_v37 = vsel %vm3105_vm4, 0, %v1139_v28  ;;  %v1143_v39 = vrot.slane %v1141_v30, 7  ;;  %v2629_v63 = vcombine.low %v2937_v24, %v3250_v6 }
  0x43   : > { %1237 = vrot.lane.b32.xlu1 %v2718_v46, %s2942_s23  ;;  %v3376_v14 = vcombine.low %v1160_v25, %v1161_v37  ;;  %v1177_v47 = vrot.slane %v1144_v40, 1  ;;  %v1196_v50 = vsel %vm3224_vm8, %v1176_v45, 0 }
  0x44   : > { %v1146_v46 = vor.u32 %v1144_v40, %v1143_v39  ;;  %v3393_v29 = vcombine.low %v1195_v36, %v1196_v50 }
  0x45   : > { %1489 = vmatpush1.bf16.msra.mxu1 %v2857_v57  ;;  %v1178_v52 = vor.u32 %v1177_v47, %v1141_v30 }
  0x46   : > { %1263 = vrot.lane.b32.xlu0 %v2638_v53, %s2938_s13  ;;  %1490 = vmatprep.subr.bf16.mxu1 %v2937_v24  ;;  %v1162_v51 = vsel %vm3105_vm4, 0, %v1146_v46 }
  0x47   : > { %1277 = vrot.lane.b32.xlu1 %v2642_v56, %s2944_s14  ;;  %v2644_v31 = vcombine.low %v1161_v37, %v1162_v51  ;;  %v3398_v53 = vsel %vm3224_vm8, %v1178_v52, 0  ;;  %v2724_v56 = vpack.c.bf16 %v3333_v5, %v3309_v55  ;;  %v2653_v10 = vcombine.low %v1162_v51, %v2937_v24 }
  0x48   : > { %v2652_v9 = vcombine.low %v1196_v50, %v3398_v53 }
  0x49   : > { %1491 = vmatpush1.bf16.msra.mxu1 %v2858_v2 }
  0x4a   : > { %1291 = vrot.lane.b32.xlu0 %v2722_v59, %s2939_s20  ;;  %1492 = vmatprep.subr.bf16.mxu1 %v2937_v24 }
  0x4b   : > { %1305 = vrot.lane.b32.xlu1 %v2650_v60, %s2945_s17 }
  0x4d   : > { %1493 = vmatpush1.bf16.msra.mxu1 %v2859_v23 }
  0x4e   : > { %1314 = vrot.lane.b32.xlu0 %v3337_v42, %s2941_s19  ;;  %1494 = vmatprep.subr.bf16.mxu1 %v2937_v24 }
  0x4f   : > { %1323 = vrot.lane.b32.xlu1 %v2719_v7, %s2946_s22 }
  0x51   : > { %1495 = vmatpush1.bf16.msra.mxu1 %v2860_v32 }
  0x52   : > { %1239 = vrot.lane.b32.xlu0 %v2719_v7, %s2942_s23  ;;  %1496 = vmatprep.subr.bf16.mxu1 %v2937_v24 }
  0x53   : > { %1265 = vrot.lane.b32.xlu1 %v3353_v4, %s2938_s13 }
  0x55   : > { %1497 = vmatpush1.bf16.msra.mxu1 %v2861_v43 }
  0x56   : > { %1279 = vrot.lane.b32.xlu0 %v2643_v33, %s2944_s14  ;;  %1498 = vmatprep.subr.bf16.mxu1 %v2937_v24 }
  0x57   : > { %1293 = vrot.lane.b32.xlu1 %v2723_v35, %s2939_s20 }
  0x59   : > { %1499 = vmatpush1.bf16.msra.mxu1 %v2862_v48 }
  0x5a   : > { %1307 = vrot.lane.b32.xlu0 %v2651_v44, %s2945_s17  ;;  %2766 = vmatprep.subr.bf16.mxu1 %v2937_v24 }
  0x5b   : > { %1316 = vrot.lane.b32.xlu1 %v3376_v14, %s2941_s19 }
  0x5e   : > { %1325 = vrot.lane.b32.xlu0 %v2720_v49, %s2946_s22 }
  0x5f   : > { %1241 = vrot.lane.b32.xlu1 %v2720_v49, %s2942_s23 }
  0x62   : > { %1267 = vrot.lane.b32.xlu0 %v3393_v29, %s2938_s13 }
  0x63   : > { %1281 = vrot.lane.b32.xlu1 %v2644_v31, %s2944_s14 }
  0x66   : > { %1295 = vrot.lane.b32.xlu0 %v2724_v56, %s2939_s20 }
  0x67   : > { %1309 = vrot.lane.b32.xlu1 %v2652_v9, %s2945_s17 }
  0x6a   : > { %1318 = vrot.lane.b32.xlu0 %v2653_v10, %s2941_s19 }
  0x6b   : > { %1327 = vrot.lane.b32.xlu1 %v2654_v19, %s2946_s22 }
  0x94   : > { %v406_v12 = vpop.permute.xlu0 %405 }
  0x95   : > { %v521_v60 = vsel %vm518_vm10, %v3178_v34, %v406_v12 }
  0x9c   : > { %v497_v20 = vpop.permute.xlu1 %496 }
  0xa0   : > { %v486_v57 = vpop.permute.xlu0 %485 }
  0xa1   : > { %v531_v55 = vsel %vm518_vm10, %v466_v58, %v486_v57  ;;  %v428_v59 = vpop.permute.xlu1 %427 }
  0xa2   : > { %v533_v62 = vsel %vm522_vm12, %v531_v55, %v497_v20  ;;  %v524_v0 = vsel %vm522_vm12, %v521_v60, %v428_v59 }
  0xa4   : > { %v508_v61 = vpop.permute.xlu0 %507 }
  0xa5   : > { %v535_v1 = vsel %vm525_vm13, %v533_v62, %v508_v61  ;;  %v448_v2 = vpop.permute.xlu1 %447 }
  0xa6   : > { %716 = vmatprep.mubr.bf16.mxu0 %v535_v1  ;;  %v527_v26 = vsel %vm525_vm13, %v524_v0, %v448_v2 }
  0xa7   : > { %717 = vmatmul.mubr.bf16.vlgmr.msra.gmra.mrb[0].mxu0 %v527_v26 }
  0xa8   : > { %v1236_v54 = vpop.permute.xlu0 %1235 }
  0xa9   : > { %v1333_v58 = vsel %vm1330_vm11, %v2629_v63, %v1236_v54  ;;  %v1262_v5 = vpop.permute.xlu1 %1261 }
  0xaa   : > { %v1344_v34 = vsel %vm518_vm10, %v1333_v58, %v1262_v5  ;;  %v2947_v5 = vmov 1966171168  }
  0xac   : > { %v1276_v7 = vpop.permute.xlu0 %1275 }
  0xad   : > { %v1353_v13 = vsel %vm1351_vm14, %v1344_v34, %v1276_v7  ;;  %v1290_v6 = vpop.permute.xlu1 %1289  ;;  %v770_v34 = vunpack.c.l.s4 %v2947_v5 }
  0xae   : > { %v1361_v15 = vsel %vm522_vm12, %v1353_v13, %v1290_v6 }
  0xaf   : > { %v771_v7 = vunpack.c.0.s8 %v770_v34 }
  0xb0   : > { %v1304_v17 = vpop.permute.xlu0 %1303 }
  0xb1   : > { %v1370_v18 = vsel %vm1368_vm15, %v1361_v15, %v1304_v17  ;;  %v1313_v21 = vpop.permute.xlu1 %1312  ;;  %v774_v17 = vsub.s32 %v771_v7, %v3042_v3 }
  0xb2   : > { %v1378_v22 = vsel %vm525_vm13, %v1370_v18, %v1313_v21 }
  0xb4   : > { %v1322_v23 = vpop.permute.xlu0 %1321 }
  0xb5   : > { %v1387_v25 = vsel %vm1385_vm0, %v1378_v22, %v1322_v23  ;;  %v1238_v27 = vpop.permute.xlu1 %1237 }
  0xb6   : > { %v1336_v28 = vsel %vm1330_vm11, %v3284_v41, %v1238_v27  ;;  %1515 = vmatmul.mubr.bf16.vlgmr.msra.gmra.mrb[4].mxu1 %v1387_v25 }
  0xb7   : > { %2666 = vmatprep.mubr.msk.bf16.mxu1 %vm1330_vm11, %v3353_v4 }
  0xb8   : > { %v1264_v30 = vpop.permute.xlu0 %1263 }
  0xb9   : > { %v1346_v32 = vsel %vm518_vm10, %v1336_v28, %v1264_v30  ;;  %v1278_v33 = vpop.permute.xlu1 %1277  ;;  %v3464_v30 = vsub.s32 0, %v3042_v3 }
  0xba   : > { %v1355_v35 = vsel %vm1351_vm14, %v1346_v32, %v1278_v33 }
  0xbc   : > { %v1292_v36 = vpop.permute.xlu0 %1291 }
  0xbd   : > { %v1363_v16 = vsel %vm522_vm12, %v1355_v35, %v1292_v36  ;;  %v1306_v37 = vpop.permute.xlu1 %1305 }
  0xbe   : > { %v1372_v39 = vsel %vm1368_vm15, %v1363_v16, %v1306_v37 }
  0xc0   : > { %v1315_v40 = vpop.permute.xlu0 %1314 }
  0xc1   : > { %v1380_v43 = vsel %vm525_vm13, %v1372_v39, %v1315_v40  ;;  %v1324_v41 = vpop.permute.xlu1 %1323 }
  0xc2   : > { %v1390_v44 = vsel %vm1385_vm0, %v1380_v43, %v1324_v41 }
  0xc3   : > { %1523 = vmatmul.mubr.bf16.gmra.mrb[8].mxu1 %v1390_v44 }
  0xc4   : > { %v1240_v4 = vpop.permute.xlu0 %1239  ;;  %2667 = vmatprep.mubr.msk.bf16.mxu1 %vm1330_vm11, %v3393_v29  ;;  %v2655_v29 = vcombine.low %v3398_v53, %v2937_v24 }
  0xc5   : > { %v1339_v45 = vsel %vm1330_vm11, %v3337_v42, %v1240_v4  ;;  %v1266_v46 = vpop.permute.xlu1 %1265 }
  0xc6   : > { %v1348_v47 = vsel %vm518_vm10, %v1339_v45, %v1266_v46 }
  0xc8   : > { %v1280_v48 = vpop.permute.xlu0 %1279 }
  0xc9   : > { %v1357_v49 = vsel %vm1351_vm14, %v1348_v47, %v1280_v48  ;;  %v1294_v50 = vpop.permute.xlu1 %1293 }
  0xca   : > { %v1365_v51 = vsel %vm522_vm12, %v1357_v49, %v1294_v50 }
  0xcc   : > { %v1308_v52 = vpop.permute.xlu0 %1307 }
  0xcd   : > { %v1374_v31 = vsel %vm1368_vm15, %v1365_v51, %v1308_v52  ;;  %v1317_v56 = vpop.permute.xlu1 %1316 }
  0xce   : > { %v1382_v9 = vsel %vm525_vm13, %v1374_v31, %v1317_v56 }
  0xd0   : > { %v1326_v10 = vpop.permute.xlu0 %1325 }
  0xd1   : > { %v1242_v42 = vpop.permute.xlu1 %1241  ;;  %v1393_v19 = vsel %vm1385_vm0, %v1382_v9, %v1326_v10 }
  0xd2   : > { %v1342_v12 = vsel %vm1330_vm11, %v3376_v14, %v1242_v42  ;;  %1531 = vmatmul.mubr.bf16.gmra.mrb[12].mxu1 %v1393_v19 }
  0xd3   : > { %2668 = vmatprep.mubr.msk.bf16.mxu1 %vm1330_vm11, %v2655_v29 }
  0xd4   : > { %v1268_v20 = vpop.permute.xlu0 %1267 }
  0xd5   : > { %v1350_v57 = vsel %vm518_vm10, %v1342_v12, %v1268_v20  ;;  %v1282_v55 = vpop.permute.xlu1 %1281 }
  0xd6   : > { %v1359_v59 = vsel %vm1351_vm14, %v1350_v57, %v1282_v55 }
  0xd8   : > { %v1296_v60 = vpop.permute.xlu0 %1295 }
  0xd9   : > { %v1367_v61 = vsel %vm522_vm12, %v1359_v59, %v1296_v60  ;;  %v1310_v53 = vpop.permute.xlu1 %1309 }
  0xda   : > { %v1376_v62 = vsel %vm1368_vm15, %v1367_v61, %v1310_v53 }
  0xdc   : > { %v1319_v63 = vpop.permute.xlu0 %1318 }
  0xdd   : > { %v1384_v0 = vsel %vm525_vm13, %v1376_v62, %v1319_v63  ;;  %v1328_v1 = vpop.permute.xlu1 %1327 }
  0xde   : > { %v1396_v14 = vsel %vm1385_vm0, %v1384_v0, %v1328_v1 }
  0xdf   : > { %1539 = vmatmul.mubr.bf16.gmra.mrb[16].mxu1 %v1396_v14 }
 0x10b   : > { %v759_v2 = vpop.f32.mrb[0].mxu1 }
 0x10c   : > { %v2764_v26 = vpop.f32.mrb[1].mxu1 }
 0x10d   : > { %v762_v54 = vpop.f32.mrb[2].mxu1 }
 0x10e   : > { %v2765_v58 = vpop.f32.mrb[3].mxu1 }
 0x17a   : > { %v2749_v13 = vpop.f32.mrb[0].mxu0 }
 0x17b   : > { %v2750_v6 = vpop.f32.mrb[1].mxu0 }
 0x17c   : > { %v2751_v15 = vadd.f32 %v2750_v6, %v2749_v13  ;;  %v2752_v18 = vpop.f32.mrb[2].mxu0 }
 0x17d   : > { %v2753_v21 = vpop.f32.mrb[3].mxu0 }
 0x17e   : > { %v760_v22 = vadd.f32 %v2751_v15, %v759_v2  ;;  %v2754_v23 = vadd.f32 %v2753_v21, %v2752_v18 }
 0x180   : > { %v768_v25 = vcombine.high %v760_v22, %v760_v22  ;;  %v775_v27 = vrot.slane %v760_v22, %v774_v17  ;;  %v763_v28 = vadd.f32 %v2754_v23, %v762_v54  ;;  %v2669_v22 = vld [vmem:[%s4073_s4] ss:$0 sm:$0xff] }
 0x182   : > { %v782_v32 = vrot.slane %v768_v25, %v774_v17  ;;  %v783_v33 = vcombine.high %v775_v27, %v775_v27  ;;  %v3466_v35 = vrot.slane %v775_v27, %v774_v17  ;;  %v824_v40 = vrot.slane %v763_v28, %v774_v17 }
 0x183   : > { %v817_v31 = vcombine.high %v763_v28, %v763_v28  ;;  %v3579_v27 = vrot.slane %v2669_v22, %v3058_v8  ;;  %v1761_v28 = vcombine.high %v2669_v22, %v2669_v22 }
 0x184   : > { %v885_v36 = vrot.slane %v3466_v35, %v3464_v30  ;;  %v3470_v16 = vrot.slane %v783_v33, %v774_v17  ;;  %v3474_v37 = vcombine.high %v3466_v35, %v3466_v35  ;;  %v784_v39 = vcombine.high %v782_v32, %v782_v32 }
 0x185   : > { %v3486_v44 = vrot.slane %v782_v32, %v774_v17  ;;  %v832_v45 = vcombine.high %v824_v40, %v824_v40  ;;  %v3495_v50 = vrot.slane %v824_v40, %v774_v17  ;;  %v831_v42 = vrot.slane %v817_v31, %v774_v17 }
 0x186   : > { %946 = vrot.lane.b32.xlu0 %v885_v36, %s2946_s22  ;;  %v889_v3 = vrot.slane %v3470_v16, %v3464_v30  ;;  %v3481_v43 = vcombine.high %v3470_v16, %v3470_v16  ;;  %v893_v41 = vrot.slane %v3474_v37, %v3464_v30  ;;  %v3491_v47 = vrot.slane %v784_v39, %v774_v17 }
 0x187   : > { %v901_v51 = vrot.slane %v3486_v44, %v3464_v30  ;;  %v3503_v9 = vrot.slane %v832_v45, %v774_v17  ;;  %v917_v29 = vrot.slane %v3495_v50, %v3464_v30  ;;  %v3510_v10 = vcombine.high %v3486_v44, %v3486_v44 }
 0x188   : > { %948 = vrot.lane.b32.xlu1 %v889_v3, %s2946_s22  ;;  %v897_v46 = vrot.slane %v3481_v43, %v3464_v30  ;;  %v905_v56 = vrot.slane %v3491_v47, %v3464_v30  ;;  %v3517_v12 = vcombine.high %v3491_v47, %v3491_v47  ;;  %v3524_v57 = vcombine.high %v3495_v50, %v3495_v50 }
 0x189   : > { %v1516_v4 = vpop.f32.mrb[4].mxu1  ;;  %v921_v19 = vrot.slane %v3503_v9, %v3464_v30  ;;  %v909_v20 = vrot.slane %v3510_v10, %v3464_v30  ;;  %v833_v55 = vcombine.high %v831_v42, %v831_v42  ;;  %v3531_v60 = vcombine.high %v3503_v9, %v3503_v9 }
 0x18a   : > { %950 = vrot.lane.b32.xlu0 %v893_v41, %s2946_s22  ;;  %v1518_v48 = vpop.f32.mrb[5].mxu1  ;;  %v913_v59 = vrot.slane %v3517_v12, %v3464_v30  ;;  %v925_v62 = vrot.slane %v3524_v57, %v3464_v30  ;;  %v3538_v63 = vrot.slane %v831_v42, %v774_v17  ;;  %v1555_v23 = vcombine.high %v1516_v4, %v1516_v4 }
 0x18b   : > { %v3493_v49 = vpop.f32.mrb[6].mxu1  ;;  %v929_v14 = vrot.slane %v3531_v60, %v3464_v30  ;;  %v3545_v2 = vrot.slane %v833_v55, %v774_v17  ;;  %v1562_v25 = vrot.slane %v1516_v4, %v3058_v8  ;;  %v3587_v40 = vcombine.high %v3579_v27, %v3579_v27 }
 0x18c   : > { %952 = vrot.lane.b32.xlu1 %v897_v46, %s2946_s22  ;;  %v1521_v52 = vpop.f32.mrb[7].mxu1  ;;  %v933_v26 = vrot.slane %v3538_v63, %v3464_v30  ;;  %v3552_v54 = vcombine.high %v3538_v63, %v3538_v63  ;;  %v3590_v3 = vrot.slane %v1761_v28, %v3058_v8 }
 0x18d   : > { %v937_v58 = vrot.slane %v3545_v2, %v3464_v30  ;;  %v3559_v5 = vcombine.high %v3545_v2, %v3545_v2  ;;  %v1570_v32 = vcombine.high %v1562_v25, %v1562_v25 }
 0x18e   : > { %954 = vrot.lane.b32.xlu0 %v901_v51, %s2946_s22  ;;  %v941_v34 = vrot.slane %v3552_v54, %v3464_v30 }
 0x18f   : > { %v945_v7 = vrot.slane %v3559_v5, %v3464_v30  ;;  %v1569_v30 = vrot.slane %v1555_v23, %v3058_v8 }
 0x190   : > { %956 = vrot.lane.b32.xlu1 %v905_v56, %s2946_s22 }
 0x191   : > { %v1571_v48 = vcombine.high %v1569_v30, %v1569_v30 }
 0x192   : > { %962 = vrot.lane.b32.xlu0 %v917_v29, %s2946_s22 }
 0x194   : > { %964 = vrot.lane.b32.xlu1 %v921_v19, %s2946_s22  ;;  %v3607_v19 = vcombine.high %v3590_v3, %v3590_v3 }
 0x196   : > { %958 = vrot.lane.b32.xlu0 %v909_v20, %s2946_s22  ;;  %v3533_v61 = vpop.f32.mrb[8].mxu1 }
 0x197   : > { %v1526_v53 = vpop.f32.mrb[9].mxu1 }
 0x198   : > { %960 = vrot.lane.b32.xlu1 %v913_v59, %s2946_s22  ;;  %v3540_v0 = vpop.f32.mrb[10].mxu1 }
 0x199   : > { %v1529_v1 = vpop.f32.mrb[11].mxu1 }
 0x19a   : > { %966 = vrot.lane.b32.xlu0 %v925_v62, %s2946_s22 }
 0x19c   : > { %968 = vrot.lane.b32.xlu1 %v929_v14, %s2946_s22 }
 0x19e   : > { %970 = vrot.lane.b32.xlu0 %v933_v26, %s2946_s22 }
 0x1a0   : > { %972 = vrot.lane.b32.xlu1 %v937_v58, %s2946_s22 }
 0x1a2   : > { %974 = vrot.lane.b32.xlu0 %v941_v34, %s2946_s22 }
 0x1a4   : > { %976 = vrot.lane.b32.xlu1 %v945_v7, %s2946_s22 }
 0x1a5   : > { %v3568_v13 = vpop.f32.mrb[12].mxu1 }
 0x1a6   : > { %v1534_v6 = vpop.f32.mrb[13].mxu1 }
 0x1a7   : > { %v3570_v15 = vpop.f32.mrb[14].mxu1  ;;  %v1623_v6 = vcombine.high %v3568_v13, %v3568_v13 }
 0x1a8   : > { %v1537_v17 = vpop.f32.mrb[15].mxu1 }
 0x1b2   : > { %v3572_v18 = vpop.f32.mrb[16].mxu1 }
 0x1b3   : > { %v1542_v21 = vpop.f32.mrb[17].mxu1 }
 0x1b4   : > { %v3597_v51 = vpop.f32.mrb[18].mxu1 }
 0x1b5   : > { %v1545_v31 = vpop.f32.mrb[19].mxu1 }
 0x1f8   : > { %v947_v33 = vpop.permute.xlu0 %946 }
 0x1f9   : > { %v995_v36 = vsel %vm338_vm2, %v3466_v35, %v947_v33  ;;  %v1596_v35 = vrot.slane %v3533_v61, %v3058_v8 }
 0x1fa   : > { %v949_v39 = vpop.permute.xlu1 %948  ;;  %1027 = vrot.lane.b32.xlu0 %v995_v36, %s2941_s19  ;;  %v1723_v41 = vadd.f32 %v1562_v25, %v995_v36 }
 0x1fb   : > { %v996_v4 = vsel %vm338_vm2, %v3470_v16, %v949_v39  ;;  %v1589_v16 = vcombine.high %v3533_v61, %v3533_v61  ;;  %v1604_v53 = vcombine.high %v1596_v35, %v1596_v35 }
 0x1fc   : > { %v951_v45 = vpop.permute.xlu0 %950  ;;  %v1724_v46 = vadd.f32 %v1570_v32, %v996_v4  ;;  %1029 = vrot.lane.b32.xlu1 %v996_v4, %s2941_s19  ;;  %v1782_v20 = vadd.f32 %v3579_v27, %v1723_v41  ;;  %v1637_v41 = vrot.slane %v1623_v6, %v3058_v8 }
 0x1fd   : > { %v997_v52 = vsel %vm338_vm2, %v3474_v37, %v951_v45  ;;  %v1630_v37 = vrot.slane %v3568_v13, %v3058_v8  ;;  %v1603_v26 = vrot.slane %v1589_v16, %v3058_v8 }
 0x1fe   : > { %v1783_v56 = vadd.f32 %v3587_v40, %v1724_v46  ;;  %v953_v29 = vpop.permute.xlu1 %952  ;;  %v1725_v42 = vadd.f32 %v1569_v30, %v997_v52  ;;  %1031 = vrot.lane.b32.xlu0 %v997_v52, %s2941_s19  ;;  %v1814_v7 = vmax.f32 %v1782_v20, 0.0  ;;  %v1657_v20 = vcombine.high %v3572_v18, %v3572_v18 }
 0x1ff   : > { %v998_v55 = vsel %vm338_vm2, %v3481_v43, %v953_v29  ;;  %v1638_v17 = vcombine.high %v1630_v37, %v1630_v37  ;;  %v1605_v45 = vcombine.high %v1603_v26, %v1603_v26 }
 0x200   : > { %v1784_v59 = vadd.f32 %v3590_v3, %v1725_v42  ;;  %v955_v62 = vpop.permute.xlu0 %954  ;;  %v1726_v1 = vadd.f32 %v1571_v48, %v998_v55  ;;  %1033 = vrot.lane.b32.xlu1 %v998_v55, %s2941_s19  ;;  %v1815_v61 = vmax.f32 %v1783_v56, 0.0 }
 0x201   : > { %v999_v14 = vsel %vm338_vm2, %v3486_v44, %v955_v62 }
 0x202   : > { %v1785_v58 = vadd.f32 %v3607_v19, %v1726_v1  ;;  %v1731_v34 = vadd.f32 %v1596_v35, %v999_v14  ;;  %1035 = vrot.lane.b32.xlu0 %v999_v14, %s2941_s19  ;;  %v957_v43 = vpop.permute.xlu1 %956  ;;  %v1816_v22 = vmax.f32 %v1784_v59, 0.0  ;;  %v1878_v30 = vcombine.low %v1814_v7, %v1815_v61 }
 0x203   : > { %v1000_v21 = vsel %vm338_vm2, %v3491_v47, %v957_v43  ;;  %v1639_v59 = vcombine.high %v1637_v41, %v1637_v41  ;;  %v1671_v7 = vrot.slane %v1657_v20, %v3058_v8 }
 0x204   : > { %v1817_v23 = vmax.f32 %v1785_v58, 0.0  ;;  %v1790_v44 = vadd.f32 %v3579_v27, %v1731_v34  ;;  %v963_v25 = vpop.permute.xlu0 %962  ;;  %v1732_v28 = vadd.f32 %v1604_v53, %v1000_v21  ;;  %1037 = vrot.lane.b32.xlu1 %v1000_v21, %s2941_s19  ;;  %v1886_v31 = vrot.slane %v1878_v30, %v3058_v8 }
 0x205   : > { %v1003_v32 = vsel %vm338_vm2, %v3495_v50, %v963_v25 }
 0x206   : > { %v1879_v33 = vcombine.low %v1816_v22, %v1817_v23  ;;  %v1791_v36 = vadd.f32 %v3587_v40, %v1732_v28  ;;  %v1739_v13 = vadd.f32 %v1630_v37, %v1003_v32  ;;  %1043 = vrot.lane.b32.xlu0 %v1003_v32, %s2941_s19  ;;  %v965_v39 = vpop.permute.xlu1 %964  ;;  %v1822_v47 = vmax.f32 %v1790_v44, 0.0 }
 0x207   : > { %v1004_v4 = vsel %vm338_vm2, %v3503_v9, %v965_v39  ;;  %v1664_v37 = vrot.slane %v3572_v18, %v3058_v8 }
 0x208   : > { %v1893_v46 = vrot.slane %v1879_v33, %v3058_v8  ;;  %v1823_v35 = vmax.f32 %v1791_v36, 0.0  ;;  %v1798_v48 = vadd.f32 %v3579_v27, %v1739_v13  ;;  %v959_v50 = vpop.permute.xlu0 %958  ;;  %v1740_v52 = vadd.f32 %v1638_v17, %v1004_v4  ;;  %1045 = vrot.lane.b32.xlu1 %v1004_v4, %s2941_s19 }
 0x209   : > { %v1001_v56 = vsel %vm338_vm2, %v3510_v10, %v959_v50  ;;  %v1672_v6 = vcombine.high %v1664_v37, %v1664_v37 }
 0x20a   : > { %v3640_v29 = vcombine.low %v1822_v47, %v1823_v35  ;;  %v1799_v42 = vadd.f32 %v3587_v40, %v1740_v52  ;;  %1039 = vrot.lane.b32.xlu0 %v1001_v56, %s2941_s19  ;;  %v1733_v9 = vadd.f32 %v1603_v26, %v1001_v56  ;;  %v961_v16 = vpop.permute.xlu1 %960  ;;  %v3650_v53 = vcombine.low %v1886_v31, %v1893_v46 }
 0x20b   : > { %v1002_v55 = vsel %vm338_vm2, %v3517_v12, %v961_v16  ;;  %v1830_v10 = vmax.f32 %v1798_v48, 0.0  ;;  %v1673_v47 = vcombine.high %v1671_v7, %v1671_v7 }
 0x20c   : > { %v1831_v62 = vmax.f32 %v1799_v42, 0.0  ;;  %v1792_v1 = vadd.f32 %v3590_v3, %v1733_v9  ;;  %v967_v61 = vpop.permute.xlu0 %966  ;;  %1041 = vrot.lane.b32.xlu1 %v1002_v55, %s2941_s19  ;;  %v1734_v14 = vadd.f32 %v1605_v45, %v1002_v55  ;;  %v2022_v12 = vpack.c.bf16 %v3650_v53, %v3650_v53 }
 0x20d   : > { %v1005_v26 = vsel %vm338_vm2, %v3524_v57, %v967_v61  ;;  %v1920_v31 = vrot.slane %v3640_v29, %v3058_v8 }
 0x20e   : > { %v1946_v58 = vcombine.low %v1830_v10, %v1831_v62  ;;  %v1793_v18 = vadd.f32 %v3607_v19, %v1734_v14  ;;  %1047 = vrot.lane.b32.xlu0 %v1005_v26, %s2941_s19  ;;  %v1741_v34 = vadd.f32 %v1637_v41, %v1005_v26  ;;  %v969_v43 = vpop.permute.xlu1 %968  ;;  %v2031_v21 = vshrl.u32 %v2022_v12, 16 }
 0x20f   : > { %v1006_v17 = vsel %vm338_vm2, %v3531_v60, %v969_v43  ;;  %v2034_v22 = vshll.u32 %v2022_v12, 16  ;;  %v1824_v23 = vmax.f32 %v1792_v1, 0.0 }
 0x210   : > { %v1825_v57 = vmax.f32 %v1793_v18, 0.0  ;;  %v1800_v44 = vadd.f32 %v3590_v3, %v1741_v34  ;;  %v971_v25 = vpop.permute.xlu0 %970  ;;  %1049 = vrot.lane.b32.xlu1 %v1006_v17, %s2941_s19  ;;  %v1742_v28 = vadd.f32 %v1639_v59, %v1006_v17  ;;  %v2033_v33 = vrot.slane %v2031_v21, 7  ;;  %v2863_v17 = vld [vmem:[%s4074_s5] sm:$0xff]  }
 0x211   : > { %v1007_v30 = vsel %vm338_vm2, %v3538_v63, %v971_v25  ;;  %v2102_v32 = vrot.slane %v2034_v22, 1  ;;  %v1954_v42 = vrot.slane %v1946_v58, %v3058_v8  ;;  %2421 = vmatpush1.bf16.msra.mxu0 %v2863_v17  ;;  %2775 = vmatpush1.bf16.msra.mxu1 %v2863_v17 }
 0x212   : > { %v1913_v36 = vcombine.low %v1824_v23, %v1825_v57  ;;  %v1801_v13 = vadd.f32 %v3607_v19, %v1742_v28  ;;  %1051 = vrot.lane.b32.xlu0 %v1007_v30, %s2941_s19  ;;  %v1747_v60 = vadd.f32 %v1664_v37, %v1007_v30  ;;  %v973_v39 = vpop.permute.xlu1 %972  ;;  %v1832_v41 = vmax.f32 %v1800_v44, 0.0  ;;  %2422 = vmatprep.subr.bf16.mxu0 %v2937_v24 }
 0x213   : > { %v1008_v4 = vsel %vm338_vm2, %v3545_v2, %v973_v39  ;;  %v2103_v45 = vor.u32 %v2102_v32, %v2031_v21  ;;  %v3671_v46 = vor.u32 %v2034_v22, %v2033_v33  ;;  %v2674_v2 = vcombine.low %v2937_v24, %v2022_v12  ;;  %2767 = vmatprep.subr.bf16.mxu1 %v2937_v24 }
 0x214   : > { %v1927_v35 = vrot.slane %v1913_v36, %v3058_v8  ;;  %v1833_v63 = vmax.f32 %v1801_v13, 0.0  ;;  %v1806_v48 = vadd.f32 %v3579_v27, %v1747_v60  ;;  %v975_v50 = vpop.permute.xlu0 %974  ;;  %1053 = vrot.lane.b32.xlu1 %v1008_v4, %s2941_s19  ;;  %v1748_v52 = vadd.f32 %v1672_v6, %v1008_v4 }
 0x215   : > { %v1009_v56 = vsel %vm338_vm2, %v3552_v54, %v975_v50  ;;  %v3688_v29 = vsel %vm3224_vm8, %v2103_v45, 0  ;;  %v1572_v21 = vcombine.high %v3493_v49, %v3493_v49  ;;  %v1579_v22 = vrot.slane %v3493_v49, %v3058_v8 }
 0x216   : > { %v1947_v9 = vcombine.low %v1832_v41, %v1833_v63  ;;  %v1807_v16 = vadd.f32 %v3587_v40, %v1748_v52  ;;  %1055 = vrot.lane.b32.xlu0 %v1009_v56, %s2941_s19  ;;  %v1749_v20 = vadd.f32 %v1671_v7, %v1009_v56  ;;  %v977_v55 = vpop.permute.xlu1 %976  ;;  %v1838_v37 = vmax.f32 %v1806_v48, 0.0  ;;  %v2864_v52 = vld [vmem:[%s4074_s5 + $0x8] sm:$0xff]  }
 0x217   : > { %v1010_v59 = vsel %vm338_vm2, %v3559_v5, %v977_v55  ;;  %v3690_v54 = vcombine.low %v1920_v31, %v1927_v35  ;;  %v2678_v5 = vcombine.low %v2937_v24, %v3688_v29  ;;  %v1587_v57 = vcombine.high %v1579_v22, %v1579_v22  ;;  %2423 = vmatpush1.bf16.msra.mxu0 %v2864_v52 }
 0x218   : > { %v1961_v10 = vrot.slane %v1947_v9, %v3058_v8  ;;  %v1839_v62 = vmax.f32 %v1807_v16, 0.0  ;;  %v1808_v1 = vadd.f32 %v3590_v3, %v1749_v20  ;;  %1057 = vrot.lane.b32.xlu1 %v1010_v59, %s2941_s19  ;;  %v1750_v61 = vadd.f32 %v1673_v47, %v1010_v59  ;;  %2776 = vmatpush1.bf16.msra.mxu1 %v2864_v52 }
 0x219   : > { %v1586_v44 = vrot.slane %v1572_v21, %v3058_v8  ;;  %v1606_v32 = vcombine.high %v3540_v0, %v3540_v0  ;;  %v1613_v33 = vrot.slane %v3540_v0, %v3058_v8  ;;  %v2024_v49 = vpack.c.bf16 %v3690_v54, %v3690_v54  ;;  %2424 = vmatprep.subr.bf16.mxu0 %v2937_v24 }
 0x21a   : > { %v1980_v14 = vcombine.low %v1838_v37, %v1839_v62  ;;  %v1809_v26 = vadd.f32 %v3607_v19, %v1750_v61  ;;  %2170 = vrot.lane.b32.xlu0 %v2674_v2, %s2942_s23  ;;  %v3699_v12 = vcombine.low %v1954_v42, %v1961_v10  ;;  %v1840_v58 = vmax.f32 %v1808_v1, 0.0  ;;  %2768 = vmatprep.subr.bf16.mxu1 %v2937_v24 }
 0x21b   : > { %v1588_v39 = vcombine.high %v1586_v44, %v1586_v44  ;;  %v1640_v47 = vcombine.high %v3570_v15, %v3570_v15  ;;  %v1674_v0 = vcombine.high %v3597_v51, %v3597_v51  ;;  %v1620_v50 = vrot.slane %v1606_v32, %v3058_v8 }
 0x21c   : > { %v1841_v18 = vmax.f32 %v1809_v26, 0.0  ;;  %2196 = vrot.lane.b32.xlu1 %v2678_v5, %s2938_s13  ;;  %v1988_v43 = vrot.slane %v1980_v14, %v3058_v8  ;;  %v1647_v31 = vrot.slane %v3570_v15, %v3058_v8  ;;  %v1621_v2 = vcombine.high %v1613_v33, %v1613_v33 }
 0x21d   : > { %v2048_v42 = vshll.u32 %v2024_v49, 16  ;;  %v3738_v20 = vrot.slane %v3597_v51, %v3058_v8  ;;  %v3741_v55 = vrot.slane %v1640_v47, %v3058_v8  ;;  %v2045_v37 = vshrl.u32 %v2024_v49, 16 }
 0x21e   : > { %v1981_v34 = vcombine.low %v1840_v58, %v1841_v18  ;;  %v1622_v61 = vcombine.high %v1620_v50, %v1620_v50  ;;  %v3746_v14 = vrot.slane %v1674_v0, %v3058_v8  ;;  %v1655_v26 = vcombine.high %v1647_v31, %v1647_v31  ;;  %v2865_v18 = vld [vmem:[%s4074_s5 + $0x10] sm:$0xff]  }
 0x21f   : > { %v2106_v5 = vrot.slane %v2048_v42, 1  ;;  %v3750_v58 = vpack.c.bf16 %v3699_v12, %v3699_v12  ;;  %v1689_v17 = vcombine.high %v3738_v20, %v3738_v20  ;;  %v2047_v21 = vrot.slane %v2045_v37, 7  ;;  %2425 = vmatpush1.bf16.msra.mxu0 %v2865_v18  ;;  %2777 = vmatpush1.bf16.msra.mxu1 %v2865_v18 }
 0x220   : > { %v1995_v7 = vrot.slane %v1981_v34, %v3058_v8  ;;  %v1690_v32 = vcombine.high %v3746_v14, %v3746_v14  ;;  %2426 = vmatprep.subr.bf16.mxu0 %v2937_v24  ;;  %2769 = vmatprep.subr.bf16.mxu1 %v2937_v24 }
 0x222   : > { %v3704_v6 = vcombine.low %v1988_v43, %v1995_v7  ;;  %v1656_v7 = vcombine.high %v3741_v55, %v3741_v55 }
 0x26c   : > { %v1028_v23 = vpop.permute.xlu0 %1027 }
 0x26d   : > { %v1727_v25 = vadd.f32 %v1579_v22, %v1028_v23 }
 0x26e   : > { %v1030_v28 = vpop.permute.xlu1 %1029 }
 0x26f   : > { %v1728_v30 = vadd.f32 %v1587_v57, %v1030_v28  ;;  %v1786_v41 = vadd.f32 %v3579_v27, %v1727_v25 }
 0x270   : > { %v1032_v36 = vpop.permute.xlu0 %1031 }
 0x271   : > { %v1787_v13 = vadd.f32 %v3587_v40, %v1728_v30  ;;  %v1729_v60 = vadd.f32 %v1586_v44, %v1032_v36  ;;  %v1818_v9 = vmax.f32 %v1786_v41, 0.0  ;;  %v2866_v44 = vld [vmem:[%s4074_s5 + $0x18] sm:$0xff]   ;;  %v2107_v36 = vor.u32 %v2106_v5, %v2045_v37 }
 0x272   : > { %v1034_v4 = vpop.permute.xlu1 %1033  ;;  %2427 = vmatpush1.bf16.msra.mxu0 %v2866_v44  ;;  %2778 = vmatpush1.bf16.msra.mxu1 %v2866_v44 }
 0x273   : > { %v1788_v45 = vadd.f32 %v3590_v3, %v1729_v60  ;;  %v1730_v35 = vadd.f32 %v1588_v39, %v1034_v4  ;;  %v1819_v63 = vmax.f32 %v1787_v13, 0.0  ;;  %v2059_v13 = vshrl.u32 %v3750_v58, 16  ;;  %2428 = vmatprep.subr.bf16.mxu0 %v2937_v24  ;;  %2770 = vmatprep.subr.bf16.mxu1 %v2937_v24 }
 0x274   : > { %v1036_v48 = vpop.permute.xlu0 %1035  ;;  %v2062_v60 = vshll.u32 %v3750_v58, 16  ;;  %v2050_v4 = vor.u32 %v2048_v42, %v2047_v21 }
 0x275   : > { %v1789_v56 = vadd.f32 %v3607_v19, %v1730_v35  ;;  %v1820_v59 = vmax.f32 %v1788_v45, 0.0  ;;  %v1895_v15 = vcombine.low %v1818_v9, %v1819_v63  ;;  %v1735_v34 = vadd.f32 %v1613_v33, %v1036_v48 }
 0x276   : > { %v1038_v16 = vpop.permute.xlu1 %1037  ;;  %v3786_v9 = vrot.slane %v2059_v13, 7 }
 0x277   : > { %v1821_v10 = vmax.f32 %v1789_v56, 0.0  ;;  %v1736_v62 = vadd.f32 %v1621_v2, %v1038_v16  ;;  %v1903_v25 = vrot.slane %v1895_v15, %v3058_v8  ;;  %v1794_v39 = vadd.f32 %v3579_v27, %v1735_v34  ;;  %v2867_v56 = vld [vmem:[%s4074_s5 + $0x20] sm:$0xff]  }
 0x278   : > { %v1044_v1 = vpop.permute.xlu0 %1043  ;;  %2429 = vmatpush1.bf16.msra.mxu0 %v2867_v56  ;;  %2779 = vmatpush1.bf16.msra.mxu1 %v2867_v56 }
 0x279   : > { %v1896_v51 = vcombine.low %v1820_v59, %v1821_v10  ;;  %v1743_v23 = vadd.f32 %v1647_v31, %v1044_v1  ;;  %v1795_v28 = vadd.f32 %v3587_v40, %v1736_v62  ;;  %v1826_v16 = vmax.f32 %v1794_v39, 0.0  ;;  %2430 = vmatprep.subr.bf16.mxu0 %v2937_v24  ;;  %2771 = vmatprep.subr.bf16.mxu1 %v2937_v24 }
 0x27a   : > { %v1046_v43 = vpop.permute.xlu1 %1045 }
 0x27b   : > { %v1910_v22 = vrot.slane %v1896_v51, %v3058_v8  ;;  %v1744_v57 = vadd.f32 %v1655_v26, %v1046_v43  ;;  %v1802_v45 = vadd.f32 %v3579_v27, %v1743_v23  ;;  %v1827_v48 = vmax.f32 %v1795_v28, 0.0 }
 0x27c   : > { %v1040_v30 = vpop.permute.xlu0 %1039  ;;  %v3801_v23 = vsel %vm3224_vm8, %v2107_v36, 0 }
 0x27d   : > { %v1737_v33 = vadd.f32 %v1620_v50, %v1040_v30  ;;  %v1803_v49 = vadd.f32 %v3587_v40, %v1744_v57  ;;  %v1911_v41 = vcombine.low %v1903_v25, %v1910_v22  ;;  %v1929_v51 = vcombine.low %v1826_v16, %v1827_v48 }
 0x27e   : > { %v1042_v47 = vpop.permute.xlu1 %1041  ;;  %v1834_v26 = vmax.f32 %v1802_v45, 0.0  ;;  %v3809_v30 = vpack.c.bf16 %v3704_v6, %v3704_v6 }
 0x27f   : > { %v1796_v35 = vadd.f32 %v3590_v3, %v1737_v33  ;;  %v1738_v63 = vadd.f32 %v1622_v61, %v1042_v47  ;;  %v2728_v50 = vpack.c.bf16 %v1911_v41, %v3650_v53  ;;  %v2023_v52 = vpack.c.bf16 %v1911_v41, %v1911_v41 }
 0x280   : > { %v1048_v0 = vpop.permute.xlu0 %1047  ;;  %v2725_v31 = vpack.c.bf16 %v3690_v54, %v1911_v41  ;;  %v3790_v53 = vrot.slane %v2062_v60, 1  ;;  %v1835_v37 = vmax.f32 %v1803_v49, 0.0  ;;  %v1937_v47 = vrot.slane %v1929_v51, %v3058_v8 }
 0x281   : > { %v1797_v2 = vadd.f32 %v3607_v19, %v1738_v63  ;;  %v1745_v42 = vadd.f32 %v3741_v55, %v1048_v0  ;;  %2224 = vrot.lane.b32.xlu1 %v2728_v50, %s2939_s20  ;;  %v2038_v10 = vshrl.u32 %v2023_v52, 16  ;;  %v2041_v15 = vshll.u32 %v2023_v52, 16 }
 0x282   : > { %2256 = vrot.lane.b32.xlu0 %v2725_v31, %s2946_s22  ;;  %v1050_v59 = vpop.permute.xlu1 %1049  ;;  %v1828_v62 = vmax.f32 %v1796_v35, 0.0  ;;  %v1963_v57 = vcombine.low %v1834_v26, %v1835_v37  ;;  %v3823_v63 = vsel %vm3105_vm4, 0, %v2050_v4  ;;  %v2076_v56 = vshll.u32 %v3809_v30, 16 }
 0x283   : > { %v1829_v1 = vmax.f32 %v1797_v2, 0.0  ;;  %v1804_v55 = vadd.f32 %v3590_v3, %v1745_v42  ;;  %v1746_v61 = vadd.f32 %v1656_v7, %v1050_v59  ;;  %v2104_v18 = vrot.slane %v2041_v15, 1  ;;  %v2868_v7 = vld [vmem:[%s4074_s5 + $0x28] sm:$0xff]  }
 0x284   : > { %v1052_v5 = vpop.permute.xlu0 %1051  ;;  %v2040_v34 = vrot.slane %v2038_v10, 7  ;;  %2431 = vmatpush1.bf16.msra.mxu0 %v2868_v7  ;;  %2780 = vmatpush1.bf16.msra.mxu1 %v2868_v7  ;;  %v1971_v4 = vrot.slane %v1963_v57, %v3058_v8 }
 0x285   : > { %v1930_v43 = vcombine.low %v1828_v62, %v1829_v1  ;;  %v1805_v21 = vadd.f32 %v3607_v19, %v1746_v61  ;;  %v1751_v22 = vadd.f32 %v3738_v20, %v1052_v5  ;;  %2172 = vrot.lane.b32.xlu1 %v2725_v31, %s2942_s23  ;;  %v2105_v25 = vor.u32 %v2104_v18, %v2038_v10  ;;  %v2869_v20 = vld [vmem:[%s4074_s5 + $0x30] sm:$0xff]  }
 0x286   : > { %v1054_v44 = vpop.permute.xlu1 %1053  ;;  %v2043_v28 = vor.u32 %v2041_v15, %v2040_v34  ;;  %v1836_v39 = vmax.f32 %v1804_v55, 0.0  ;;  %2432 = vmatprep.subr.bf16.mxu0 %v2937_v24  ;;  %2772 = vmatprep.subr.bf16.mxu1 %v2937_v24 }
 0x287   : > { %v1944_v33 = vrot.slane %v1930_v43, %v3058_v8  ;;  %v1837_v49 = vmax.f32 %v1805_v21, 0.0  ;;  %v1752_v36 = vadd.f32 %v1689_v17, %v1054_v44  ;;  %v1810_v41 = vadd.f32 %v3579_v27, %v1751_v22 }
 0x288   : > { %v1056_v45 = vpop.permute.xlu0 %1055  ;;  %v3819_v35 = vsel %vm3224_vm8, %v2105_v25, 0  ;;  %v3834_v0 = vsel %vm3105_vm4, 0, %v2043_v28  ;;  %2433 = vmatpush1.bf16.msra.mxu0 %v2869_v20  ;;  %2781 = vmatpush1.bf16.msra.mxu1 %v2869_v20 }
 0x289   : > { %v1964_v17 = vcombine.low %v1836_v39, %v1837_v49  ;;  %v1811_v27 = vadd.f32 %v3587_v40, %v1752_v36  ;;  %v1753_v48 = vadd.f32 %v3746_v14, %v1056_v45  ;;  %v3839_v50 = vcombine.low %v3819_v35, %v3801_v23  ;;  %2434 = vmatprep.subr.bf16.mxu0 %v2937_v24 }
 0x28a   : > { %v1058_v52 = vpop.permute.xlu1 %1057  ;;  %v1945_v31 = vcombine.low %v1937_v47, %v1944_v33  ;;  %v3853_v10 = vcombine.low %v3834_v0, %v3823_v63  ;;  %v1842_v62 = vmax.f32 %v1810_v41, 0.0  ;;  %v2064_v14 = vor.u32 %v2062_v60, %v3786_v9  ;;  %2773 = vmatprep.subr.bf16.mxu1 %v2937_v24 }
 0x28b   : > { %v1978_v2 = vrot.slane %v1964_v17, %v3058_v8  ;;  %v1843_v42 = vmax.f32 %v1811_v27, 0.0  ;;  %v1812_v40 = vadd.f32 %v3590_v3, %v1753_v48  ;;  %v1754_v16 = vadd.f32 %v1690_v32, %v1058_v52  ;;  %2707 = vmatprep.mubr.msk.bf16.mxu0 %vm1330_vm11, %v3839_v50 }
 0x28c   : > { %v2729_v37 = vpack.c.bf16 %v1945_v31, %v3690_v54  ;;  %v2726_v59 = vpack.c.bf16 %v3699_v12, %v1945_v31  ;;  %v2025_v15 = vpack.c.bf16 %v1945_v31, %v1945_v31  ;;  %v2111_v32 = vor.u32 %v3790_v53, %v2059_v13  ;;  %v2870_v54 = vld [vmem:[%s4074_s5 + $0x38] sm:$0xff]  }
 0x28d   : > { %v1813_v3 = vadd.f32 %v3607_v19, %v1754_v16  ;;  %v1979_v19 = vcombine.low %v1971_v4, %v1978_v2  ;;  %v2073_v60 = vshrl.u32 %v3809_v30, 16  ;;  %v1997_v58 = vcombine.low %v1842_v62, %v1843_v42  ;;  %2435 = vmatpush1.bf16.msra.mxu0 %v2870_v54  ;;  %2782 = vmatpush1.bf16.msra.mxu1 %v2870_v54 }
 0x28e   : > { %2226 = vrot.lane.b32.xlu0 %v2729_v37, %s2939_s20  ;;  %2258 = vrot.lane.b32.xlu1 %v2726_v59, %s2946_s22  ;;  %v2052_v1 = vshrl.u32 %v2025_v15, 16  ;;  %v2055_v55 = vshll.u32 %v2025_v15, 16  ;;  %v1844_v9 = vmax.f32 %v1812_v40, 0.0  ;;  %v2114_v53 = vrot.slane %v2076_v56, 1 }
 0x28f   : > { %v1845_v13 = vmax.f32 %v1813_v3, 0.0  ;;  %v3873_v61 = vpack.c.bf16 %v3704_v6, %v1979_v19  ;;  %v2730_v51 = vpack.c.bf16 %v1979_v19, %v3699_v12  ;;  %2436 = vmatprep.subr.bf16.mxu0 %v2937_v24  ;;  %2774 = vmatprep.subr.bf16.mxu1 %v2937_v24  ;;  %v2027_v34 = vpack.c.bf16 %v1979_v19, %v1979_v19  ;;  %v2871_v12 = vld [vmem:[%s4074_s5 + $0x40] sm:$0xff]  }
 0x290   : > { %v2054_v26 = vrot.slane %v2052_v1, 7  ;;  %v2108_v5 = vrot.slane %v2055_v55, 1  ;;  %v2098_v21 = vsel %vm3105_vm4, 0, %v2064_v14  ;;  %v2075_v7 = vrot.slane %v2073_v60, 7 }
 0x291   : > { %v1998_v18 = vcombine.low %v1844_v9, %v1845_v13  ;;  %v2005_v57 = vrot.slane %v1997_v58, %v3058_v8  ;;  %v2066_v25 = vshrl.u32 %v2027_v34, 16  ;;  %v2069_v28 = vshll.u32 %v2027_v34, 16  ;;  %2437 = vmatpush1.bf16.msra.mxu0 %v2871_v12  ;;  %2783 = vmatpush1.bf16.msra.mxu1 %v2871_v12 }
 0x292   : > { %2174 = vrot.lane.b32.xlu0 %v2726_v59, %s2942_s23  ;;  %2176 = vrot.lane.b32.xlu1 %v3873_v61, %s2942_s23  ;;  %v2057_v43 = vor.u32 %v2055_v55, %v2054_v26  ;;  %v2109_v22 = vor.u32 %v2108_v5, %v2052_v1  ;;  %v2130_v49 = vsel %vm3224_vm8, %v2111_v32, 0  ;;  %v2115_v36 = vor.u32 %v2114_v53, %v2073_v60  ;;  %v2171_v60 = vpop.permute.xlu0 %2170 }
 0x293   : > { %v2012_v44 = vrot.slane %v1998_v18, %v3058_v8  ;;  %v2112_v17 = vrot.slane %v2069_v28, 1  ;;  %v2068_v27 = vrot.slane %v2066_v25, 7  ;;  %v2078_v48 = vor.u32 %v2076_v56, %v2075_v7 }
 0x294   : > { %v2097_v33 = vsel %vm3105_vm4, 0, %v2057_v43  ;;  %v2129_v39 = vsel %vm3224_vm8, %v2109_v22, 0  ;;  %v2094_v4 = vsel %vm3105_vm4, 0, %v3671_v46  ;;  %v2132_v56 = vsel %vm3224_vm8, %v2115_v36, 0 }
 0x295   : > { %v2013_v47 = vcombine.low %v2005_v57, %v2012_v44  ;;  %v2683_v41 = vcombine.low %v3823_v63, %v2097_v33  ;;  %v3895_v45 = vcombine.low %v2097_v33, %v2098_v21  ;;  %v2691_v8 = vcombine.low %v3801_v23, %v2129_v39 }
 0x296   : > { %2228 = vrot.lane.b32.xlu0 %v2730_v51, %s2939_s20  ;;  %v3899_v20 = vcombine.low %v2129_v39, %v2130_v49  ;;  %v2682_v31 = vcombine.low %v2094_v4, %v3834_v0  ;;  %v2113_v2 = vor.u32 %v2112_v17, %v2066_v25  ;;  %v2071_v23 = vor.u32 %v2069_v28, %v2068_v27 }
 0x297   : > { %v2731_v52 = vpack.c.bf16 %v2013_v47, %v3704_v6  ;;  %v2029_v63 = vpack.c.bf16 %v2013_v47, %v2013_v47  ;;  %v2100_v6 = vsel %vm3105_vm4, 0, %v2078_v48  ;;  %v2690_v15 = vcombine.low %v3688_v29, %v3819_v35  ;;  %v2197_v35 = vpop.permute.xlu1 %2196 }
 0x298   : > { %v2131_v30 = vsel %vm3224_vm8, %v2113_v2, 0  ;;  %v2099_v46 = vsel %vm3105_vm4, 0, %v2071_v23  ;;  %v2670_v26 = vcombine.low %v2937_v24, %v2094_v4 }
 0x299   : > { %2230 = vrot.lane.b32.xlu1 %v2731_v52, %s2939_s20  ;;  %v2083_v42 = vshll.u32 %v2029_v63, 16  ;;  %v2080_v40 = vshrl.u32 %v2029_v63, 16  ;;  %v3918_v16 = vcombine.low %v2131_v30, %v2132_v56  ;;  %v2684_v37 = vcombine.low %v2098_v21, %v2099_v46 }
 0x29a   : > { %2210 = vrot.lane.b32.xlu0 %v2682_v31, %s2944_s14  ;;  %v2692_v62 = vcombine.low %v2130_v49, %v2131_v30  ;;  %v3922_v3 = vcombine.low %v2099_v46, %v2100_v6  ;;  %v2695_v11 = vcombine.low %v2029_v63, %v2937_v24  ;;  %v2267_v34 = vsel %vm1330_vm11, %v2670_v26, %v2171_v60 }
 0x29b   : > { %v2116_v0 = vrot.slane %v2083_v42, 1  ;;  %v2082_v59 = vrot.slane %v2080_v40, 7  ;;  %v2278_v21 = vsel %vm518_vm10, %v2267_v34, %v2197_v35 }
 0x29d   : > { %2247 = vrot.lane.b32.xlu1 %v3853_v10, %s2941_s19  ;;  %v2117_v14 = vor.u32 %v2116_v0, %v2080_v40  ;;  %v2085_v32 = vor.u32 %v2083_v42, %v2082_v59 }
 0x29e   : > { %2238 = vrot.lane.b32.xlu0 %v2690_v15, %s2945_s17 }
 0x29f   : > { %v2133_v54 = vsel %vm3224_vm8, %v2117_v14, 0  ;;  %v2101_v19 = vsel %vm3105_vm4, 0, %v2085_v32 }
 0x2a0   : > { %v2696_v1 = vcombine.low %v2133_v54, %v2937_v24  ;;  %v2685_v55 = vcombine.low %v2100_v6, %v2101_v19  ;;  %v2693_v29 = vcombine.low %v2132_v56, %v2133_v54  ;;  %v2694_v38 = vcombine.low %v2101_v19, %v2937_v24  ;;  %v2697_v54 = vld [vmem:[%s4075_s6] ss:$0 sm:$0xff] }
 0x2a1   : > { %2212 = vrot.lane.b32.xlu1 %v2683_v41, %s2944_s14 }
 0x2a2   : > { %2198 = vrot.lane.b32.xlu0 %v3839_v50, %s2938_s13  ;;  %2710 = vmatprep.mubr.msk.bf16.mxu1 %vm1330_vm11, %v2696_v1 }
 0x2a5   : > { %2240 = vrot.lane.b32.xlu1 %v2691_v8, %s2945_s17 }
 0x2a6   : > { %2249 = vrot.lane.b32.xlu0 %v3895_v45, %s2941_s19 }
 0x2a9   : > { %2202 = vrot.lane.b32.xlu1 %v3918_v16, %s2938_s13 }
 0x2aa   : > { %2200 = vrot.lane.b32.xlu0 %v3899_v20, %s2938_s13  ;;  %s284_s13 = sand.u32 1, %s2926_s25  }
 0x2ad   : > { %2216 = vrot.lane.b32.xlu1 %v2685_v55, %s2944_s14 }
 0x2ae   : > { %2214 = vrot.lane.b32.xlu0 %v2684_v37, %s2944_s14  ;;  %s2602_s14 = sshll.u32 %s284_s13, 5 }
 0x2b1   : > { %2244 = vrot.lane.b32.xlu1 %v2693_v29, %s2945_s17 }
 0x2b2   : > { %2242 = vrot.lane.b32.xlu0 %v2692_v62, %s2945_s17  ;;  %s3997_s17 = scalar_lea.vmem [#allocation2], %s2602_s14 }
 0x2b3   : > { %s2524_s9 = sshll.u32 %s3997_s17, 4  ;;  %s4018_s9 = int_to_ptr.vmem [resolvable:$true] %s2524_s9 }
 0x2b4   : > { %s2872_s8 = scalar_lea.vmem %s4018_s9, 512  ;;  %p2879_p0 = scmp.lt.s32.totalorder %s4018_s9, %s2877_s16 }
 0x2b5   : > { %2253 = vrot.lane.b32.xlu1 %v2694_v38, %s2941_s19  ;;  %p2873_p11 = scmp.ne.s32.totalorder %s4018_s9, %s2872_s8 }
 0x2b6   : > { %2251 = vrot.lane.b32.xlu0 %v3922_v3, %s2941_s19  ;;  %s2878_s19 = scalar_lea.vmem %s2877_s16, 1024 }
 0x2b7   : > { %p2874_p12 = pnand %p2873_p11, %p3028_p5  ;;  %p2880_p1 = scmp.lt.s32.totalorder %s2878_s19, %s2872_s8 }
 0x2b9   : > { %2262 = vrot.lane.b32.xlu1 %v2695_v11, %s2946_s22  ;;  %p2875_p13 = pneg %p2874_p12  ;;  %p2881_p2 = por %p2880_p1, %p2879_p0 }
 0x2ba   : > { %2260 = vrot.lane.b32.xlu0 %v3873_v61, %s2946_s22  ;;  %s2732_s22 = sshll.u32 %s3011_s28, 9  ;;  %s4026_s28 = scalar_lea.sflag [#allocation3], %s284_s13 }
 0x2bb   : > { %s4014_s29 = scalar_lea.hbm %s4076_s7, %s2732_s22  ;;  %p2882_p3 = pnand %p2881_p2, %p2875_p13 }
 0x2f3   : > { %v2225_v50 = vpop.permute.xlu1 %2224 }
 0x2f4   : > { %v2257_v58 = vpop.permute.xlu0 %2256 }
 0x2f7   : > { %v2173_v9 = vpop.permute.xlu1 %2172 }
 0x2f8   : > { %v2270_v33 = vsel %vm1330_vm11, %v3853_v10, %v2173_v9 }
 0x300   : > { %v2227_v13 = vpop.permute.xlu0 %2226  ;;  %v2259_v53 = vpop.permute.xlu1 %2258 }
 0x304   : > { %v2175_v51 = vpop.permute.xlu0 %2174  ;;  %v2177_v5 = vpop.permute.xlu1 %2176 }
 0x305   : > { %v2276_v31 = vsel %vm1330_vm11, %v3922_v3, %v2177_v5  ;;  %v2273_v23 = vsel %vm1330_vm11, %v3895_v45, %v2175_v51 }
 0x308   : > { %v2229_v18 = vpop.permute.xlu0 %2228 }
 0x30b   : > { %v2231_v43 = vpop.permute.xlu1 %2230 }
 0x30c   : > { %v2211_v22 = vpop.permute.xlu0 %2210 }
 0x30d   : > { %v2286_v61 = vsel %vm1351_vm14, %v2278_v21, %v2211_v22 }
 0x30e   : > { %v2294_v57 = vsel %vm522_vm12, %v2286_v61, %v2225_v50 }
 0x30f   : > { %v2248_v7 = vpop.permute.xlu1 %2247 }
 0x310   : > { %v2239_v12 = vpop.permute.xlu0 %2238 }
 0x311   : > { %v2302_v44 = vsel %vm1368_vm15, %v2294_v57, %v2239_v12 }
 0x312   : > { %v2310_v25 = vsel %vm525_vm13, %v2302_v44, %v2248_v7 }
 0x313   : > { %v2318_v24 = vsel %vm1385_vm0, %v2310_v25, %v2257_v58  ;;  %v2213_v28 = vpop.permute.xlu1 %2212 }
 0x314   : > { %v2199_v39 = vpop.permute.xlu0 %2198  ;;  %2453 = vmatmul.mubr.bf16.vlgmr.msra.gmra.mrb[4].mxu0 %v2318_v24 }
 0x315   : > { %v2280_v49 = vsel %vm518_vm10, %v2270_v33, %v2199_v39  ;;  %2708 = vmatprep.mubr.msk.bf16.mxu0 %vm1330_vm11, %v3899_v20 }
 0x316   : > { %v2288_v36 = vsel %vm1351_vm14, %v2280_v49, %v2213_v28 }
 0x317   : > { %v2296_v47 = vsel %vm522_vm12, %v2288_v36, %v2227_v13  ;;  %v2241_v41 = vpop.permute.xlu1 %2240 }
 0x318   : > { %v2250_v8 = vpop.permute.xlu0 %2249  ;;  %v2304_v17 = vsel %vm1368_vm15, %v2296_v47, %v2241_v41 }
 0x319   : > { %v2312_v27 = vsel %vm525_vm13, %v2304_v17, %v2250_v8 }
 0x31a   : > { %v2321_v48 = vsel %vm1385_vm0, %v2312_v27, %v2259_v53 }
 0x31b   : > { %v2203_v10 = vpop.permute.xlu1 %2202 }
 0x31c   : > { %v2201_v4 = vpop.permute.xlu0 %2200  ;;  %2461 = vmatmul.mubr.bf16.gmra.mrb[8].mxu0 %v2321_v48  ;;  %v2284_v42 = vsel %vm518_vm10, %v2276_v31, %v2203_v10 }
 0x31d   : > { %2709 = vmatprep.mubr.msk.bf16.mxu0 %vm1330_vm11, %v3918_v16  ;;  %v2282_v40 = vsel %vm518_vm10, %v2273_v23, %v2201_v4 }
 0x31f   : > { %v2217_v52 = vpop.permute.xlu1 %2216 }
 0x320   : > { %v2215_v20 = vpop.permute.xlu0 %2214  ;;  %v2292_v30 = vsel %vm1351_vm14, %v2284_v42, %v2217_v52 }
 0x321   : > { %v2290_v56 = vsel %vm1351_vm14, %v2282_v40, %v2215_v20  ;;  %v2300_v0 = vsel %vm522_vm12, %v2292_v30, %v2231_v43 }
 0x322   : > { %v2298_v16 = vsel %vm522_vm12, %v2290_v56, %v2229_v18 }
 0x323   : > { %v2245_v63 = vpop.permute.xlu1 %2244 }
 0x324   : > { %v2243_v2 = vpop.permute.xlu0 %2242  ;;  %v2308_v37 = vsel %vm1368_vm15, %v2300_v0, %v2245_v63 }
 0x325   : > { %v2306_v45 = vsel %vm1368_vm15, %v2298_v16, %v2243_v2 }
 0x327   : > { %v2254_v46 = vpop.permute.xlu1 %2253 }
 0x328   : > { %v2252_v6 = vpop.permute.xlu0 %2251  ;;  %v2316_v59 = vsel %vm525_vm13, %v2308_v37, %v2254_v46 }
 0x329   : > { %v2314_v62 = vsel %vm525_vm13, %v2306_v45, %v2252_v6 }
 0x32b   : > { %v2263_v15 = vpop.permute.xlu1 %2262 }
 0x32c   : > { %v2261_v3 = vpop.permute.xlu0 %2260  ;;  %v2327_v14 = vsel %vm1385_vm0, %v2316_v59, %v2263_v15 }
 0x32d   : > { %v2324_v32 = vsel %vm1385_vm0, %v2314_v62, %v2261_v3  ;;  %2477 = vmatmul.mubr.bf16.vlgmr.msra.gmra.mrb[20].mxu1 %v2327_v14 }
 0x32e   : > { %2469 = vmatmul.mubr.bf16.gmra.mrb[12].mxu0 %v2324_v32 }
 0x3e7   : > { %v2454_v19 = vpop.f32.mrb[4].mxu0 }
 0x3e8   : > { %v2455_v1 = vadd.f32 %v2697_v54, %v2454_v19  ;;  %v2456_v55 = vpop.f32.mrb[5].mxu0 }
 0x3e9   : > { %v2457_v29 = vpop.f32.mrb[6].mxu0 }
 0x3ea   : > { %v2485_v38 = vmax.f32 %v2455_v1, 0.0  ;;  %v2458_v11 = vadd.f32 %v2697_v54, %v2457_v29  ;;  %v2459_v35 = vpop.f32.mrb[7].mxu0 }
 0x3ec   : > { %v2493_v50 = vpack.c.bf16 %v2485_v38, %v2485_v38  ;;  %v2486_v60 = vmax.f32 %v2458_v11, 0.0 }
 0x3ee   : > { %2502 = vst.msk [vmem:[%s3997_s17] sm:$0xf] %vm2501_vm1, %v2493_v50  ;;  %v2494_v58 = vpack.c.bf16 %v2486_v60, %v2486_v60 }
 0x3ef   : > { %v2462_v9 = vpop.f32.mrb[8].mxu0 }
 0x3f0   : > { %2503 = vst.msk [vmem:[%s3997_s17 + $0x4] sm:$0xf] %vm2501_vm1, %v2494_v58  ;;  %v2463_v13 = vadd.f32 %v2697_v54, %v2462_v9  ;;  %v2464_v53 = vpop.f32.mrb[9].mxu0 }
 0x3f1   : > { %v2465_v51 = vpop.f32.mrb[10].mxu0 }
 0x3f2   : > { %v2487_v26 = vmax.f32 %v2463_v13, 0.0  ;;  %v2466_v5 = vadd.f32 %v2697_v54, %v2465_v51  ;;  %v2467_v18 = vpop.f32.mrb[11].mxu0 }
 0x3f4   : > { %v2495_v34 = vpack.c.bf16 %v2487_v26, %v2487_v26  ;;  %v2488_v43 = vmax.f32 %v2466_v5, 0.0 }
 0x3f6   : > { %2504 = vst.msk [vmem:[%s3997_s17 + $0x8] sm:$0xf] %vm2501_vm1, %v2495_v34  ;;  %v2496_v21 = vpack.c.bf16 %v2488_v43, %v2488_v43 }
 0x3f8   : > { %2505 = vst.msk [vmem:[%s3997_s17 + $0xc] sm:$0xf] %vm2501_vm1, %v2496_v21 }
 0x400   : > { %v2478_v22 = vpop.f32.mrb[20].mxu1 }
 0x401   : > { %v2470_v61 = vpop.f32.mrb[12].mxu0  ;;  %v2479_v7 = vadd.f32 %v2697_v54, %v2478_v22  ;;  %v2480_v12 = vpop.f32.mrb[21].mxu1 }
 0x402   : > { %v2471_v57 = vadd.f32 %v2697_v54, %v2470_v61  ;;  %v2472_v44 = vpop.f32.mrb[13].mxu0  ;;  %v2481_v25 = vpop.f32.mrb[22].mxu1 }
 0x403   : > { %v2491_v24 = vmax.f32 %v2479_v7, 0.0  ;;  %v2473_v28 = vpop.f32.mrb[14].mxu0  ;;  %v2482_v33 = vadd.f32 %v2697_v54, %v2481_v25  ;;  %v2483_v39 = vpop.f32.mrb[23].mxu1 }
 0x404   : > { %v2489_v49 = vmax.f32 %v2471_v57, 0.0  ;;  %v2474_v36 = vadd.f32 %v2697_v54, %v2473_v28  ;;  %v2475_v47 = vpop.f32.mrb[15].mxu0 }
 0x405   : > { %v2499_v41 = vpack.c.bf16 %v2491_v24, %v2491_v24  ;;  %v2492_v8 = vmax.f32 %v2482_v33, 0.0 }
 0x406   : > { %v2497_v17 = vpack.c.bf16 %v2489_v49, %v2489_v49  ;;  %v2490_v27 = vmax.f32 %v2474_v36, 0.0 }
 0x407   : > { %2508 = vst.msk [vmem:[%s3997_s17 + $0x18] sm:$0xf] %vm2501_vm1, %v2499_v41  ;;  %v2500_v48 = vpack.c.bf16 %v2492_v8, %v2492_v8 }
 0x408   : > { %2506 = vst.msk [vmem:[%s3997_s17 + $0x10] sm:$0xf] %vm2501_vm1, %v2497_v17  ;;  %v2498_v10 = vpack.c.bf16 %v2490_v27, %v2490_v27 }
 0x409   : > { %2509 = vst.msk [vmem:[%s3997_s17 + $0x1c] sm:$0xf] %vm2501_vm1, %v2500_v48 }
 0x40a   : > { %2507 = vst.msk [vmem:[%s3997_s17 + $0x14] sm:$0xf] %vm2501_vm1, %v2498_v10 }
 0x40b   : > { %2885 = shalt.err (!%p2882_p3)
}
 0x40c   : > { %s2886_s13 = scalar_lea.hbm %s4014_s29, 512  ;;  %s2890_s17 = scalar_lea.hbm %s4076_s7, 1024 }
 0x40d   : > { %p2887_p4 = scmp.ne.s32.totalorder %s4014_s29, %s2886_s13  ;;  %p2891_p9 = scmp.lt.u32.totalorder %s4014_s29, %s4076_s7 }
 0x40e   : > { %p2892_p10 = scmp.lt.u32.totalorder %s2890_s17, %s2886_s13  ;;  %p2894_p12 = scmp.lt.u32.totalorder %s2886_s13, %s4014_s29 }
 0x40f   : > { %p2888_p7 = pnand %p2887_p4, %p3028_p5 }
 0x410   : > { %p2893_p11 = por %p2892_p10, %p2891_p9 }
 0x411   : > { %p2889_p8 = pneg %p2888_p7 }
 0x412   : > { %p2895_p13 = por %p2894_p12, %p2893_p11 }
 0x414   : > { %p2896_p0 = pnand %p2895_p13, %p2889_p8 }
 0x416   : > { %2899 = shalt.err (!%p2896_p0)
}
 0x417   : > { %s2949_s21 = smov 4  }
 0x418   : > { %2784 = dma.vmem_to_hbm [thread:$0]  (%p3028_p5), %s4018_s9, 512, %s4014_s29, %s4026_s28, %s2939_s20, %s2939_s20, %s2949_s21  }
 0x419 PF: > { %p2790_p1 = scmp.ge.s32.totalorder %s2934_s27, 2  ;;  %s2539_s8 = sand.u32 1, %s2922_s24  }
 0x41a   : > { %s2540_s15 = scalar_lea.sflag [#allocation3], %s2539_s8 }
 0x41b   : > { %p2787_p2 = pnand %p2790_p1, %p3032_p6 }
 0x41d   : > { %2917 = dma.done.wait (!%p2787_p2), %s2540_s15, 512  }
 0x41e   : > { %2919 = vsyncadd (!%p2787_p2), %s2540_s15, 4294966784  ;;  %p17_p3 = scmp.ge.s32.totalorder %s3015_s30, 4   ;;  %s4085_s24 = smov %s2926_s25 }
 0x41f   : > { %s4086_s25 = smov %s2930_s26  ;;  %s4087_s26 = smov %s3026_s10 }
 0x420   : > { %s4088_s27 = smov %s3015_s30  ;;  %19 = sbr.rel (!%p17_p3) target bundleno = 3 (0x3), region = 86 }
 0x427   :  { %2545 = vsyncpa [#allocation3], 1 }
 0x428   :  { %2547 = vsyncpa [#allocation3 + $0x1], 1 }

</bundles_post_ra>
